<compile_context>
chip_gen: v6e
topology: v6e:2x2x1
jax: 0.10.0
libtpu: 0.0.40
codegen_flags: <defaults>
</compile_context>

<pallas_src>
import functools

import jax
import jax.numpy as jnp
from jax.experimental import pallas as pl
from jax.experimental.pallas import tpu as pltpu


def gru_kernel(tok_ref, emb_ref, wx_ref, bx_ref, wh_ref, bh_ref, fcw_ref, fcb_ref,
               out_ref, y_ref, x_scratch, gx_scratch,
               *, hid_dim, hid_num, seq_len, batch, batch_pad):
    H, T, B, BP = hid_dim, seq_len, batch, batch_pad

    # ---- fused embedding gather --------------------------------------------------
    # tokens are SMEM scalars; emb is VMEM resident as (vocab, 1, H) so emb_ref[tok]
    # is a tile-aligned dynamic leading-axis row read. Pad rows (b >= B) stay zero.
    x_scratch[...] = jnp.zeros_like(x_scratch)
    for t in range(T):
        for b in range(B):
            tok = tok_ref[t, b]
            x_scratch[pl.ds(t * BP + b, 1), :] = emb_ref[tok]          # (1, H) row

    # ---- hoisted input projection: ONE MXU pass over all T*BP rows ----------------
    # Row stride per time step is BP (a multiple of the 8-row sublane tile), so every
    # per-t slice of gx_scratch below is tile-aligned -> no sublane shuffles per step.
    gx_scratch[...] = (
        jnp.dot(x_scratch[...], wx_ref[...], preferred_element_type=jnp.float32)
        + bx_ref[...])                                                 # (T*BP, 3H)

    wh = wh_ref[...]                                                   # (H, 3H) resident
    bh = bh_ref[...]                                                   # (1, 3H)

    def step(gx, h):
        # gx: (BP, 3H) precomputed x-projection; h: (BP, H). Rows >= B are dead padding
        # (row-wise math only, so they never contaminate the valid rows).
        gh = jnp.dot(h, wh, preferred_element_type=jnp.float32) + bh
        r = jax.nn.sigmoid(gx[:, 0:H] + gh[:, 0:H])
        z = jax.nn.sigmoid(gx[:, H:2 * H] + gh[:, H:2 * H])
        n = jnp.tanh(gx[:, 2 * H:3 * H] + r * gh[:, 2 * H:3 * H])
        return (1.0 - z) * n + z * h

    # ---- t == 0 : every inner hid_num iteration restarts from h0 = 0 -> one step ---
    h = step(gx_scratch[0:BP, :], jnp.zeros((BP, H), jnp.float32))
    out_ref[:, 0:H] = h[0:B, :]

    # ---- t > 0 : hid_num chained steps per token; emit torch.cat(out, 1) directly --
    # TODO(synk): cap the unroll of this time loop (e.g. blocks of 4) if T ever scales
    #             into the hundreds; at T=8 full unroll is fastest.
    for t in range(1, T):
        gx = gx_scratch[t * BP:(t + 1) * BP, :]                        # 8-sublane aligned
        for _ in range(hid_num):
            h = step(gx, h)
        out_ref[:, t * H:(t + 1) * H] = h[0:B, :]

    # ---- classification head: exactly once, on the final hidden state --------------
    y = jnp.dot(h, fcw_ref[...], preferred_element_type=jnp.float32) + fcb_ref[...]
    y_ref[...] = y[0:B, :]


def pack_gru_params(emb, w1, b1, fc_w, fc_b):
    """One-time weight repack (call at init, NOT per forward).

    Re-packs the interleaved (r_x, r_h, z_x, z_h, n_x, n_h) column blocks of w1/b1 into
    contiguous Wx/Wh (and bx/bh) so the kernel issues wide N=3H matmuls, transposes the
    fc weight, and relays the embedding table as (vocab, 1, H) for leading-axis gathers.
    """
    H = w1.shape[0]

    def pick(m, idxs):
        return jnp.concatenate([m[:, i * H:(i + 1) * H] for i in idxs], axis=1)

    return dict(
        emb3=emb.astype(jnp.float32).reshape(emb.shape[0], 1, emb.shape[1]),
        wx=pick(w1, (0, 2, 4)), wh=pick(w1, (1, 3, 5)),
        bx=pick(b1, (0, 2, 4)), bh=pick(b1, (1, 3, 5)),
        fcwT=fc_w.T, fcb=fc_b)


def gru_forward(tokens, params, hid_num):
    """Per-call path: a single fused pallas_call, no other XLA ops."""
    T, B = tokens.shape
    _, _, H = params["emb3"].shape
    C = params["fcwT"].shape[1]
    BP = (B + 7) // 8 * 8                       # batch padded to the 8-row sublane tile

    kernel = functools.partial(gru_kernel, hid_dim=H, hid_num=hid_num,
                               seq_len=T, batch=B, batch_pad=BP)
    vmem = pl.BlockSpec(memory_space=pltpu.MemorySpace.VMEM)
    smem = pl.BlockSpec(memory_space=pltpu.MemorySpace.SMEM)

    out, y = pl.pallas_call(
        kernel,
        out_shape=(jax.ShapeDtypeStruct((B, T * H), jnp.float32),   # torch.cat(out, 1)
                   jax.ShapeDtypeStruct((B, C), jnp.float32)),      # fc1(h_{T-1})
        in_specs=[smem, vmem, vmem, vmem, vmem, vmem, vmem, vmem],
        out_specs=(vmem, vmem),
        scratch_shapes=[pltpu.VMEM((T * BP, H), jnp.float32),       # gathered embeddings
                        pltpu.VMEM((T * BP, 3 * H), jnp.float32)],  # hoisted x-projection
    )(tokens, params["emb3"], params["wx"], params["bx"],
      params["wh"], params["bh"], params["fcwT"], params["fcb"])
    return y, out


def gru_ref(tokens, emb, w1, b1, fc_w, fc_b, hid_num):
    """Pure-JAX reference mirroring the PyTorch forward exactly (original w1 layout)."""
    x = jnp.take(emb, tokens, axis=0).astype(jnp.float32)
    T, B, H = x.shape

    def lin(v, i):
        return v @ w1[:, i * H:(i + 1) * H] + b1[:, i * H:(i + 1) * H]

    def step(xv, h):
        r = jax.nn.sigmoid(lin(xv, 0) + lin(h, 1))
        z = jax.nn.sigmoid(lin(xv, 2) + lin(h, 3))
        n = jnp.tanh(lin(xv, 4) + r * lin(h, 5))
        return (1.0 - z) * n + z * h

    outs = []
    h = jnp.zeros((B, H), jnp.float32)
    for t in range(T):
        if t == 0:
            h = step(x[t], jnp.zeros((B, H), jnp.float32))
        else:
            for _ in range(hid_num):
                h = step(x[t], h)
        outs.append(h)
    out = jnp.concatenate(outs, axis=1)
    y = h @ fc_w.T + fc_b
    return y, out


if __name__ == "__main__":
    # Small shapes consistent with the module (emb_size == hid_dim).
    T, B = 8, 4
    vocab_size, emb_size, hid_dim, hid_num, class_num = 50, 32, 32, 2, 10

    key = jax.random.PRNGKey(0)
    k_tok, k_emb, k_w1, k_fcw, k_fcb = jax.random.split(key, 5)

    tokens = jax.random.randint(k_tok, (T, B), 0, vocab_size, dtype=jnp.int32)
    emb = jax.random.normal(k_emb, (vocab_size, emb_size), jnp.float32)
    w1 = jax.random.normal(k_w1, (hid_dim, hid_dim * 6), jnp.float32) * 0.01
    b1 = jnp.zeros((1, hid_dim * 6), jnp.float32)
    fc_w = jax.random.normal(k_fcw, (class_num, hid_dim), jnp.float32) * 0.1
    fc_b = jax.random.normal(k_fcb, (1, class_num), jnp.float32) * 0.1
    # NOTE: hweight[1:]/hbias[1:] exist in __init__ but forward_step is always called
    # with lnum=0, so they are never materialized here.

    params = pack_gru_params(emb, w1, b1, fc_w, fc_b)       # one-time, outside hot path
    fwd = jax.jit(functools.partial(gru_forward, hid_num=hid_num))

    y, out = fwd(tokens, params)
    jax.block_until_ready((y, out))

    y_exp, out_exp = gru_ref(tokens, emb, w1, b1, fc_w, fc_b, hid_num)
    assert y.shape == (B, class_num) and out.shape == (B, T * hid_dim)
    assert jnp.allclose(y, y_exp, rtol=1e-3, atol=1e-3)
    assert jnp.allclose(out, out_exp, rtol=1e-3, atol=1e-3)

    print("KERNEL_OK")
</pallas_src>

<mosaic_0001>
module attributes {stable_mosaic.version = 11 : i64} {
  func.func @gru_kernel(%arg0: memref<8x4xi32, #tpu.memory_space<smem>>, %arg1: memref<50x1x32xf32, #tpu.memory_space<vmem>>, %arg2: memref<32x96xf32, #tpu.memory_space<vmem>>, %arg3: memref<1x96xf32, #tpu.memory_space<vmem>>, %arg4: memref<32x96xf32, #tpu.memory_space<vmem>>, %arg5: memref<1x96xf32, #tpu.memory_space<vmem>>, %arg6: memref<32x10xf32, #tpu.memory_space<vmem>>, %arg7: memref<1x10xf32, #tpu.memory_space<vmem>>, %arg8: memref<4x256xf32, #tpu.memory_space<vmem>>, %arg9: memref<4x10xf32, #tpu.memory_space<vmem>>, %arg10: memref<64x32xf32, #tpu.memory_space<vmem>>, %arg11: memref<64x96xf32, #tpu.memory_space<vmem>>) attributes {dimension_semantics = [], scalar_prefetch = 0 : i64, scratch_operands = 2 : i64, tpu.core_type = #tpu.core_type<tc>} {
    %cst = arith.constant 0.000000e+00 : f32
    %0 = vector.broadcast %cst : f32 to vector<64x32xf32>
    %c0 = arith.constant 0 : index
    %c0_0 = arith.constant 0 : index
    %1 = vector.load %arg10[%c0, %c0_0] : memref<64x32xf32, #tpu.memory_space<vmem>>, vector<64x32xf32>
    tpu.vector_store %arg10[%c0, %c0_0], %0 {strides = array<i32>} : memref<64x32xf32, #tpu.memory_space<vmem>>, vector<64x32xf32>,
    %c0_1 = arith.constant 0 : index
    %c0_2 = arith.constant 0 : index
    %2 = memref.load %arg0[%c0_1, %c0_2] : memref<8x4xi32, #tpu.memory_space<smem>>
    %3 = arith.index_cast %2 : i32 to index
    %c0_3 = arith.constant 0 : index
    %c0_4 = arith.constant 0 : index
    %4 = vector.load %arg1[%3, %c0_3, %c0_4] : memref<50x1x32xf32, #tpu.memory_space<vmem>>, vector<1x1x32xf32>
    %5 = vector.shape_cast %4 : vector<1x1x32xf32> to vector<1x32xf32>
    %c0_5 = arith.constant 0 : index
    %c0_6 = arith.constant 0 : index
    %6 = vector.load %arg10[%c0_5, %c0_6] : memref<64x32xf32, #tpu.memory_space<vmem>>, vector<1x32xf32>
    tpu.vector_store %arg10[%c0_5, %c0_6], %5 {strides = array<i32>} : memref<64x32xf32, #tpu.memory_space<vmem>>, vector<1x32xf32>,
    %c0_7 = arith.constant 0 : index
    %c1 = arith.constant 1 : index
    %7 = memref.load %arg0[%c0_7, %c1] : memref<8x4xi32, #tpu.memory_space<smem>>
    %8 = arith.index_cast %7 : i32 to index
    %c0_8 = arith.constant 0 : index
    %c0_9 = arith.constant 0 : index
    %9 = vector.load %arg1[%8, %c0_8, %c0_9] : memref<50x1x32xf32, #tpu.memory_space<vmem>>, vector<1x1x32xf32>
    %10 = vector.shape_cast %9 : vector<1x1x32xf32> to vector<1x32xf32>
    %c1_10 = arith.constant 1 : index
    %c0_11 = arith.constant 0 : index
    %11 = vector.load %arg10[%c1_10, %c0_11] : memref<64x32xf32, #tpu.memory_space<vmem>>, vector<1x32xf32>
    tpu.vector_store %arg10[%c1_10, %c0_11], %10 {strides = array<i32>} : memref<64x32xf32, #tpu.memory_space<vmem>>, vector<1x32xf32>,
    %c0_12 = arith.constant 0 : index
    %c2 = arith.constant 2 : index
    %12 = memref.load %arg0[%c0_12, %c2] : memref<8x4xi32, #tpu.memory_space<smem>>
    %13 = arith.index_cast %12 : i32 to index
    %c0_13 = arith.constant 0 : index
    %c0_14 = arith.constant 0 : index
    %14 = vector.load %arg1[%13, %c0_13, %c0_14] : memref<50x1x32xf32, #tpu.memory_space<vmem>>, vector<1x1x32xf32>
    %15 = vector.shape_cast %14 : vector<1x1x32xf32> to vector<1x32xf32>
    %c2_15 = arith.constant 2 : index
    %c0_16 = arith.constant 0 : index
    %16 = vector.load %arg10[%c2_15, %c0_16] : memref<64x32xf32, #tpu.memory_space<vmem>>, vector<1x32xf32>
    tpu.vector_store %arg10[%c2_15, %c0_16], %15 {strides = array<i32>} : memref<64x32xf32, #tpu.memory_space<vmem>>, vector<1x32xf32>,
    %c0_17 = arith.constant 0 : index
    %c3 = arith.constant 3 : index
    %17 = memref.load %arg0[%c0_17, %c3] : memref<8x4xi32, #tpu.memory_space<smem>>
    %18 = arith.index_cast %17 : i32 to index
    %c0_18 = arith.constant 0 : index
    %c0_19 = arith.constant 0 : index
    %19 = vector.load %arg1[%18, %c0_18, %c0_19] : memref<50x1x32xf32, #tpu.memory_space<vmem>>, vector<1x1x32xf32>
    %20 = vector.shape_cast %19 : vector<1x1x32xf32> to vector<1x32xf32>
    %c3_20 = arith.constant 3 : index
    %c0_21 = arith.constant 0 : index
    %21 = vector.load %arg10[%c3_20, %c0_21] : memref<64x32xf32, #tpu.memory_space<vmem>>, vector<1x32xf32>
    tpu.vector_store %arg10[%c3_20, %c0_21], %20 {strides = array<i32>} : memref<64x32xf32, #tpu.memory_space<vmem>>, vector<1x32xf32>,
    %c1_22 = arith.constant 1 : index
    %c0_23 = arith.constant 0 : index
    %22 = memref.load %arg0[%c1_22, %c0_23] : memref<8x4xi32, #tpu.memory_space<smem>>
    %23 = arith.index_cast %22 : i32 to index
    %c0_24 = arith.constant 0 : index
    %c0_25 = arith.constant 0 : index
    %24 = vector.load %arg1[%23, %c0_24, %c0_25] : memref<50x1x32xf32, #tpu.memory_space<vmem>>, vector<1x1x32xf32>
    %25 = vector.shape_cast %24 : vector<1x1x32xf32> to vector<1x32xf32>
    %c8 = arith.constant 8 : index
    %c0_26 = arith.constant 0 : index
    %26 = vector.load %arg10[%c8, %c0_26] : memref<64x32xf32, #tpu.memory_space<vmem>>, vector<1x32xf32>
    tpu.vector_store %arg10[%c8, %c0_26], %25 {strides = array<i32>} : memref<64x32xf32, #tpu.memory_space<vmem>>, vector<1x32xf32>,
    %c1_27 = arith.constant 1 : index
    %c1_28 = arith.constant 1 : index
    %27 = memref.load %arg0[%c1_27, %c1_28] : memref<8x4xi32, #tpu.memory_space<smem>>
    %28 = arith.index_cast %27 : i32 to index
    %c0_29 = arith.constant 0 : index
    %c0_30 = arith.constant 0 : index
    %29 = vector.load %arg1[%28, %c0_29, %c0_30] : memref<50x1x32xf32, #tpu.memory_space<vmem>>, vector<1x1x32xf32>
    %30 = vector.shape_cast %29 : vector<1x1x32xf32> to vector<1x32xf32>
    %c9 = arith.constant 9 : index
    %c0_31 = arith.constant 0 : index
    %31 = vector.load %arg10[%c9, %c0_31] : memref<64x32xf32, #tpu.memory_space<vmem>>, vector<1x32xf32>
    tpu.vector_store %arg10[%c9, %c0_31], %30 {strides = array<i32>} : memref<64x32xf32, #tpu.memory_space<vmem>>, vector<1x32xf32>,
    %c1_32 = arith.constant 1 : index
    %c2_33 = arith.constant 2 : index
    %32 = memref.load %arg0[%c1_32, %c2_33] : memref<8x4xi32, #tpu.memory_space<smem>>
    %33 = arith.index_cast %32 : i32 to index
    %c0_34 = arith.constant 0 : index
    %c0_35 = arith.constant 0 : index
    %34 = vector.load %arg1[%33, %c0_34, %c0_35] : memref<50x1x32xf32, #tpu.memory_space<vmem>>, vector<1x1x32xf32>
    %35 = vector.shape_cast %34 : vector<1x1x32xf32> to vector<1x32xf32>
    %c10 = arith.constant 10 : index
    %c0_36 = arith.constant 0 : index
    %36 = vector.load %arg10[%c10, %c0_36] : memref<64x32xf32, #tpu.memory_space<vmem>>, vector<1x32xf32>
    tpu.vector_store %arg10[%c10, %c0_36], %35 {strides = array<i32>} : memref<64x32xf32, #tpu.memory_space<vmem>>, vector<1x32xf32>,
    %c1_37 = arith.constant 1 : index
    %c3_38 = arith.constant 3 : index
    %37 = memref.load %arg0[%c1_37, %c3_38] : memref<8x4xi32, #tpu.memory_space<smem>>
    %38 = arith.index_cast %37 : i32 to index
    %c0_39 = arith.constant 0 : index
    %c0_40 = arith.constant 0 : index
    %39 = vector.load %arg1[%38, %c0_39, %c0_40] : memref<50x1x32xf32, #tpu.memory_space<vmem>>, vector<1x1x32xf32>
    %40 = vector.shape_cast %39 : vector<1x1x32xf32> to vector<1x32xf32>
    %c11 = arith.constant 11 : index
    %c0_41 = arith.constant 0 : index
    %41 = vector.load %arg10[%c11, %c0_41] : memref<64x32xf32, #tpu.memory_space<vmem>>, vector<1x32xf32>
    tpu.vector_store %arg10[%c11, %c0_41], %40 {strides = array<i32>} : memref<64x32xf32, #tpu.memory_space<vmem>>, vector<1x32xf32>,
    %c2_42 = arith.constant 2 : index
    %c0_43 = arith.constant 0 : index
    %42 = memref.load %arg0[%c2_42, %c0_43] : memref<8x4xi32, #tpu.memory_space<smem>>
    %43 = arith.index_cast %42 : i32 to index
    %c0_44 = arith.constant 0 : index
    %c0_45 = arith.constant 0 : index
    %44 = vector.load %arg1[%43, %c0_44, %c0_45] : memref<50x1x32xf32, #tpu.memory_space<vmem>>, vector<1x1x32xf32>
    %45 = vector.shape_cast %44 : vector<1x1x32xf32> to vector<1x32xf32>
    %c16 = arith.constant 16 : index
    %c0_46 = arith.constant 0 : index
    %46 = vector.load %arg10[%c16, %c0_46] : memref<64x32xf32, #tpu.memory_space<vmem>>, vector<1x32xf32>
    tpu.vector_store %arg10[%c16, %c0_46], %45 {strides = array<i32>} : memref<64x32xf32, #tpu.memory_space<vmem>>, vector<1x32xf32>,
    %c2_47 = arith.constant 2 : index
    %c1_48 = arith.constant 1 : index
    %47 = memref.load %arg0[%c2_47, %c1_48] : memref<8x4xi32, #tpu.memory_space<smem>>
    %48 = arith.index_cast %47 : i32 to index
    %c0_49 = arith.constant 0 : index
    %c0_50 = arith.constant 0 : index
    %49 = vector.load %arg1[%48, %c0_49, %c0_50] : memref<50x1x32xf32, #tpu.memory_space<vmem>>, vector<1x1x32xf32>
    %50 = vector.shape_cast %49 : vector<1x1x32xf32> to vector<1x32xf32>
    %c17 = arith.constant 17 : index
    %c0_51 = arith.constant 0 : index
    %51 = vector.load %arg10[%c17, %c0_51] : memref<64x32xf32, #tpu.memory_space<vmem>>, vector<1x32xf32>
    tpu.vector_store %arg10[%c17, %c0_51], %50 {strides = array<i32>} : memref<64x32xf32, #tpu.memory_space<vmem>>, vector<1x32xf32>,
    %c2_52 = arith.constant 2 : index
    %c2_53 = arith.constant 2 : index
    %52 = memref.load %arg0[%c2_52, %c2_53] : memref<8x4xi32, #tpu.memory_space<smem>>
    %53 = arith.index_cast %52 : i32 to index
    %c0_54 = arith.constant 0 : index
    %c0_55 = arith.constant 0 : index
    %54 = vector.load %arg1[%53, %c0_54, %c0_55] : memref<50x1x32xf32, #tpu.memory_space<vmem>>, vector<1x1x32xf32>
    %55 = vector.shape_cast %54 : vector<1x1x32xf32> to vector<1x32xf32>
    %c18 = arith.constant 18 : index
    %c0_56 = arith.constant 0 : index
    %56 = vector.load %arg10[%c18, %c0_56] : memref<64x32xf32, #tpu.memory_space<vmem>>, vector<1x32xf32>
    tpu.vector_store %arg10[%c18, %c0_56], %55 {strides = array<i32>} : memref<64x32xf32, #tpu.memory_space<vmem>>, vector<1x32xf32>,
    %c2_57 = arith.constant 2 : index
    %c3_58 = arith.constant 3 : index
    %57 = memref.load %arg0[%c2_57, %c3_58] : memref<8x4xi32, #tpu.memory_space<smem>>
    %58 = arith.index_cast %57 : i32 to index
    %c0_59 = arith.constant 0 : index
    %c0_60 = arith.constant 0 : index
    %59 = vector.load %arg1[%58, %c0_59, %c0_60] : memref<50x1x32xf32, #tpu.memory_space<vmem>>, vector<1x1x32xf32>
    %60 = vector.shape_cast %59 : vector<1x1x32xf32> to vector<1x32xf32>
    %c19 = arith.constant 19 : index
    %c0_61 = arith.constant 0 : index
    %61 = vector.load %arg10[%c19, %c0_61] : memref<64x32xf32, #tpu.memory_space<vmem>>, vector<1x32xf32>
    tpu.vector_store %arg10[%c19, %c0_61], %60 {strides = array<i32>} : memref<64x32xf32, #tpu.memory_space<vmem>>, vector<1x32xf32>,
    %c3_62 = arith.constant 3 : index
    %c0_63 = arith.constant 0 : index
    %62 = memref.load %arg0[%c3_62, %c0_63] : memref<8x4xi32, #tpu.memory_space<smem>>
    %63 = arith.index_cast %62 : i32 to index
    %c0_64 = arith.constant 0 : index
    %c0_65 = arith.constant 0 : index
    %64 = vector.load %arg1[%63, %c0_64, %c0_65] : memref<50x1x32xf32, #tpu.memory_space<vmem>>, vector<1x1x32xf32>
    %65 = vector.shape_cast %64 : vector<1x1x32xf32> to vector<1x32xf32>
    %c24 = arith.constant 24 : index
    %c0_66 = arith.constant 0 : index
    %66 = vector.load %arg10[%c24, %c0_66] : memref<64x32xf32, #tpu.memory_space<vmem>>, vector<1x32xf32>
    tpu.vector_store %arg10[%c24, %c0_66], %65 {strides = array<i32>} : memref<64x32xf32, #tpu.memory_space<vmem>>, vector<1x32xf32>,
    %c3_67 = arith.constant 3 : index
    %c1_68 = arith.constant 1 : index
    %67 = memref.load %arg0[%c3_67, %c1_68] : memref<8x4xi32, #tpu.memory_space<smem>>
    %68 = arith.index_cast %67 : i32 to index
    %c0_69 = arith.constant 0 : index
    %c0_70 = arith.constant 0 : index
    %69 = vector.load %arg1[%68, %c0_69, %c0_70] : memref<50x1x32xf32, #tpu.memory_space<vmem>>, vector<1x1x32xf32>
    %70 = vector.shape_cast %69 : vector<1x1x32xf32> to vector<1x32xf32>
    %c25 = arith.constant 25 : index
    %c0_71 = arith.constant 0 : index
    %71 = vector.load %arg10[%c25, %c0_71] : memref<64x32xf32, #tpu.memory_space<vmem>>, vector<1x32xf32>
    tpu.vector_store %arg10[%c25, %c0_71], %70 {strides = array<i32>} : memref<64x32xf32, #tpu.memory_space<vmem>>, vector<1x32xf32>,
    %c3_72 = arith.constant 3 : index
    %c2_73 = arith.constant 2 : index
    %72 = memref.load %arg0[%c3_72, %c2_73] : memref<8x4xi32, #tpu.memory_space<smem>>
    %73 = arith.index_cast %72 : i32 to index
    %c0_74 = arith.constant 0 : index
    %c0_75 = arith.constant 0 : index
    %74 = vector.load %arg1[%73, %c0_74, %c0_75] : memref<50x1x32xf32, #tpu.memory_space<vmem>>, vector<1x1x32xf32>
    %75 = vector.shape_cast %74 : vector<1x1x32xf32> to vector<1x32xf32>
    %c26 = arith.constant 26 : index
    %c0_76 = arith.constant 0 : index
    %76 = vector.load %arg10[%c26, %c0_76] : memref<64x32xf32, #tpu.memory_space<vmem>>, vector<1x32xf32>
    tpu.vector_store %arg10[%c26, %c0_76], %75 {strides = array<i32>} : memref<64x32xf32, #tpu.memory_space<vmem>>, vector<1x32xf32>,
    %c3_77 = arith.constant 3 : index
    %c3_78 = arith.constant 3 : index
    %77 = memref.load %arg0[%c3_77, %c3_78] : memref<8x4xi32, #tpu.memory_space<smem>>
    %78 = arith.index_cast %77 : i32 to index
    %c0_79 = arith.constant 0 : index
    %c0_80 = arith.constant 0 : index
    %79 = vector.load %arg1[%78, %c0_79, %c0_80] : memref<50x1x32xf32, #tpu.memory_space<vmem>>, vector<1x1x32xf32>
    %80 = vector.shape_cast %79 : vector<1x1x32xf32> to vector<1x32xf32>
    %c27 = arith.constant 27 : index
    %c0_81 = arith.constant 0 : index
    %81 = vector.load %arg10[%c27, %c0_81] : memref<64x32xf32, #tpu.memory_space<vmem>>, vector<1x32xf32>
    tpu.vector_store %arg10[%c27, %c0_81], %80 {strides = array<i32>} : memref<64x32xf32, #tpu.memory_space<vmem>>, vector<1x32xf32>,
    %c4 = arith.constant 4 : index
    %c0_82 = arith.constant 0 : index
    %82 = memref.load %arg0[%c4, %c0_82] : memref<8x4xi32, #tpu.memory_space<smem>>
    %83 = arith.index_cast %82 : i32 to index
    %c0_83 = arith.constant 0 : index
    %c0_84 = arith.constant 0 : index
    %84 = vector.load %arg1[%83, %c0_83, %c0_84] : memref<50x1x32xf32, #tpu.memory_space<vmem>>, vector<1x1x32xf32>
    %85 = vector.shape_cast %84 : vector<1x1x32xf32> to vector<1x32xf32>
    %c32 = arith.constant 32 : index
    %c0_85 = arith.constant 0 : index
    %86 = vector.load %arg10[%c32, %c0_85] : memref<64x32xf32, #tpu.memory_space<vmem>>, vector<1x32xf32>
    tpu.vector_store %arg10[%c32, %c0_85], %85 {strides = array<i32>} : memref<64x32xf32, #tpu.memory_space<vmem>>, vector<1x32xf32>,
    %c4_86 = arith.constant 4 : index
    %c1_87 = arith.constant 1 : index
    %87 = memref.load %arg0[%c4_86, %c1_87] : memref<8x4xi32, #tpu.memory_space<smem>>
    %88 = arith.index_cast %87 : i32 to index
    %c0_88 = arith.constant 0 : index
    %c0_89 = arith.constant 0 : index
    %89 = vector.load %arg1[%88, %c0_88, %c0_89] : memref<50x1x32xf32, #tpu.memory_space<vmem>>, vector<1x1x32xf32>
    %90 = vector.shape_cast %89 : vector<1x1x32xf32> to vector<1x32xf32>
    %c33 = arith.constant 33 : index
    %c0_90 = arith.constant 0 : index
    %91 = vector.load %arg10[%c33, %c0_90] : memref<64x32xf32, #tpu.memory_space<vmem>>, vector<1x32xf32>
    tpu.vector_store %arg10[%c33, %c0_90], %90 {strides = array<i32>} : memref<64x32xf32, #tpu.memory_space<vmem>>, vector<1x32xf32>,
    %c4_91 = arith.constant 4 : index
    %c2_92 = arith.constant 2 : index
    %92 = memref.load %arg0[%c4_91, %c2_92] : memref<8x4xi32, #tpu.memory_space<smem>>
    %93 = arith.index_cast %92 : i32 to index
    %c0_93 = arith.constant 0 : index
    %c0_94 = arith.constant 0 : index
    %94 = vector.load %arg1[%93, %c0_93, %c0_94] : memref<50x1x32xf32, #tpu.memory_space<vmem>>, vector<1x1x32xf32>
    %95 = vector.shape_cast %94 : vector<1x1x32xf32> to vector<1x32xf32>
    %c34 = arith.constant 34 : index
    %c0_95 = arith.constant 0 : index
    %96 = vector.load %arg10[%c34, %c0_95] : memref<64x32xf32, #tpu.memory_space<vmem>>, vector<1x32xf32>
    tpu.vector_store %arg10[%c34, %c0_95], %95 {strides = array<i32>} : memref<64x32xf32, #tpu.memory_space<vmem>>, vector<1x32xf32>,
    %c4_96 = arith.constant 4 : index
    %c3_97 = arith.constant 3 : index
    %97 = memref.load %arg0[%c4_96, %c3_97] : memref<8x4xi32, #tpu.memory_space<smem>>
    %98 = arith.index_cast %97 : i32 to index
    %c0_98 = arith.constant 0 : index
    %c0_99 = arith.constant 0 : index
    %99 = vector.load %arg1[%98, %c0_98, %c0_99] : memref<50x1x32xf32, #tpu.memory_space<vmem>>, vector<1x1x32xf32>
    %100 = vector.shape_cast %99 : vector<1x1x32xf32> to vector<1x32xf32>
    %c35 = arith.constant 35 : index
    %c0_100 = arith.constant 0 : index
    %101 = vector.load %arg10[%c35, %c0_100] : memref<64x32xf32, #tpu.memory_space<vmem>>, vector<1x32xf32>
    tpu.vector_store %arg10[%c35, %c0_100], %100 {strides = array<i32>} : memref<64x32xf32, #tpu.memory_space<vmem>>, vector<1x32xf32>,
    %c5 = arith.constant 5 : index
    %c0_101 = arith.constant 0 : index
    %102 = memref.load %arg0[%c5, %c0_101] : memref<8x4xi32, #tpu.memory_space<smem>>
    %103 = arith.index_cast %102 : i32 to index
    %c0_102 = arith.constant 0 : index
    %c0_103 = arith.constant 0 : index
    %104 = vector.load %arg1[%103, %c0_102, %c0_103] : memref<50x1x32xf32, #tpu.memory_space<vmem>>, vector<1x1x32xf32>
    %105 = vector.shape_cast %104 : vector<1x1x32xf32> to vector<1x32xf32>
    %c40 = arith.constant 40 : index
    %c0_104 = arith.constant 0 : index
    %106 = vector.load %arg10[%c40, %c0_104] : memref<64x32xf32, #tpu.memory_space<vmem>>, vector<1x32xf32>
    tpu.vector_store %arg10[%c40, %c0_104], %105 {strides = array<i32>} : memref<64x32xf32, #tpu.memory_space<vmem>>, vector<1x32xf32>,
    %c5_105 = arith.constant 5 : index
    %c1_106 = arith.constant 1 : index
    %107 = memref.load %arg0[%c5_105, %c1_106] : memref<8x4xi32, #tpu.memory_space<smem>>
    %108 = arith.index_cast %107 : i32 to index
    %c0_107 = arith.constant 0 : index
    %c0_108 = arith.constant 0 : index
    %109 = vector.load %arg1[%108, %c0_107, %c0_108] : memref<50x1x32xf32, #tpu.memory_space<vmem>>, vector<1x1x32xf32>
    %110 = vector.shape_cast %109 : vector<1x1x32xf32> to vector<1x32xf32>
    %c41 = arith.constant 41 : index
    %c0_109 = arith.constant 0 : index
    %111 = vector.load %arg10[%c41, %c0_109] : memref<64x32xf32, #tpu.memory_space<vmem>>, vector<1x32xf32>
    tpu.vector_store %arg10[%c41, %c0_109], %110 {strides = array<i32>} : memref<64x32xf32, #tpu.memory_space<vmem>>, vector<1x32xf32>,
    %c5_110 = arith.constant 5 : index
    %c2_111 = arith.constant 2 : index
    %112 = memref.load %arg0[%c5_110, %c2_111] : memref<8x4xi32, #tpu.memory_space<smem>>
    %113 = arith.index_cast %112 : i32 to index
    %c0_112 = arith.constant 0 : index
    %c0_113 = arith.constant 0 : index
    %114 = vector.load %arg1[%113, %c0_112, %c0_113] : memref<50x1x32xf32, #tpu.memory_space<vmem>>, vector<1x1x32xf32>
    %115 = vector.shape_cast %114 : vector<1x1x32xf32> to vector<1x32xf32>
    %c42 = arith.constant 42 : index
    %c0_114 = arith.constant 0 : index
    %116 = vector.load %arg10[%c42, %c0_114] : memref<64x32xf32, #tpu.memory_space<vmem>>, vector<1x32xf32>
    tpu.vector_store %arg10[%c42, %c0_114], %115 {strides = array<i32>} : memref<64x32xf32, #tpu.memory_space<vmem>>, vector<1x32xf32>,
    %c5_115 = arith.constant 5 : index
    %c3_116 = arith.constant 3 : index
    %117 = memref.load %arg0[%c5_115, %c3_116] : memref<8x4xi32, #tpu.memory_space<smem>>
    %118 = arith.index_cast %117 : i32 to index
    %c0_117 = arith.constant 0 : index
    %c0_118 = arith.constant 0 : index
    %119 = vector.load %arg1[%118, %c0_117, %c0_118] : memref<50x1x32xf32, #tpu.memory_space<vmem>>, vector<1x1x32xf32>
    %120 = vector.shape_cast %119 : vector<1x1x32xf32> to vector<1x32xf32>
    %c43 = arith.constant 43 : index
    %c0_119 = arith.constant 0 : index
    %121 = vector.load %arg10[%c43, %c0_119] : memref<64x32xf32, #tpu.memory_space<vmem>>, vector<1x32xf32>
    tpu.vector_store %arg10[%c43, %c0_119], %120 {strides = array<i32>} : memref<64x32xf32, #tpu.memory_space<vmem>>, vector<1x32xf32>,
    %c6 = arith.constant 6 : index
    %c0_120 = arith.constant 0 : index
    %122 = memref.load %arg0[%c6, %c0_120] : memref<8x4xi32, #tpu.memory_space<smem>>
    %123 = arith.index_cast %122 : i32 to index
    %c0_121 = arith.constant 0 : index
    %c0_122 = arith.constant 0 : index
    %124 = vector.load %arg1[%123, %c0_121, %c0_122] : memref<50x1x32xf32, #tpu.memory_space<vmem>>, vector<1x1x32xf32>
    %125 = vector.shape_cast %124 : vector<1x1x32xf32> to vector<1x32xf32>
    %c48 = arith.constant 48 : index
    %c0_123 = arith.constant 0 : index
    %126 = vector.load %arg10[%c48, %c0_123] : memref<64x32xf32, #tpu.memory_space<vmem>>, vector<1x32xf32>
    tpu.vector_store %arg10[%c48, %c0_123], %125 {strides = array<i32>} : memref<64x32xf32, #tpu.memory_space<vmem>>, vector<1x32xf32>,
    %c6_124 = arith.constant 6 : index
    %c1_125 = arith.constant 1 : index
    %127 = memref.load %arg0[%c6_124, %c1_125] : memref<8x4xi32, #tpu.memory_space<smem>>
    %128 = arith.index_cast %127 : i32 to index
    %c0_126 = arith.constant 0 : index
    %c0_127 = arith.constant 0 : index
    %129 = vector.load %arg1[%128, %c0_126, %c0_127] : memref<50x1x32xf32, #tpu.memory_space<vmem>>, vector<1x1x32xf32>
    %130 = vector.shape_cast %129 : vector<1x1x32xf32> to vector<1x32xf32>
    %c49 = arith.constant 49 : index
    %c0_128 = arith.constant 0 : index
    %131 = vector.load %arg10[%c49, %c0_128] : memref<64x32xf32, #tpu.memory_space<vmem>>, vector<1x32xf32>
    tpu.vector_store %arg10[%c49, %c0_128], %130 {strides = array<i32>} : memref<64x32xf32, #tpu.memory_space<vmem>>, vector<1x32xf32>,
    %c6_129 = arith.constant 6 : index
    %c2_130 = arith.constant 2 : index
    %132 = memref.load %arg0[%c6_129, %c2_130] : memref<8x4xi32, #tpu.memory_space<smem>>
    %133 = arith.index_cast %132 : i32 to index
    %c0_131 = arith.constant 0 : index
    %c0_132 = arith.constant 0 : index
    %134 = vector.load %arg1[%133, %c0_131, %c0_132] : memref<50x1x32xf32, #tpu.memory_space<vmem>>, vector<1x1x32xf32>
    %135 = vector.shape_cast %134 : vector<1x1x32xf32> to vector<1x32xf32>
    %c50 = arith.constant 50 : index
    %c0_133 = arith.constant 0 : index
    %136 = vector.load %arg10[%c50, %c0_133] : memref<64x32xf32, #tpu.memory_space<vmem>>, vector<1x32xf32>
    tpu.vector_store %arg10[%c50, %c0_133], %135 {strides = array<i32>} : memref<64x32xf32, #tpu.memory_space<vmem>>, vector<1x32xf32>,
    %c6_134 = arith.constant 6 : index
    %c3_135 = arith.constant 3 : index
    %137 = memref.load %arg0[%c6_134, %c3_135] : memref<8x4xi32, #tpu.memory_space<smem>>
    %138 = arith.index_cast %137 : i32 to index
    %c0_136 = arith.constant 0 : index
    %c0_137 = arith.constant 0 : index
    %139 = vector.load %arg1[%138, %c0_136, %c0_137] : memref<50x1x32xf32, #tpu.memory_space<vmem>>, vector<1x1x32xf32>
    %140 = vector.shape_cast %139 : vector<1x1x32xf32> to vector<1x32xf32>
    %c51 = arith.constant 51 : index
    %c0_138 = arith.constant 0 : index
    %141 = vector.load %arg10[%c51, %c0_138] : memref<64x32xf32, #tpu.memory_space<vmem>>, vector<1x32xf32>
    tpu.vector_store %arg10[%c51, %c0_138], %140 {strides = array<i32>} : memref<64x32xf32, #tpu.memory_space<vmem>>, vector<1x32xf32>,
    %c7 = arith.constant 7 : index
    %c0_139 = arith.constant 0 : index
    %142 = memref.load %arg0[%c7, %c0_139] : memref<8x4xi32, #tpu.memory_space<smem>>
    %143 = arith.index_cast %142 : i32 to index
    %c0_140 = arith.constant 0 : index
    %c0_141 = arith.constant 0 : index
    %144 = vector.load %arg1[%143, %c0_140, %c0_141] : memref<50x1x32xf32, #tpu.memory_space<vmem>>, vector<1x1x32xf32>
    %145 = vector.shape_cast %144 : vector<1x1x32xf32> to vector<1x32xf32>
    %c56 = arith.constant 56 : index
    %c0_142 = arith.constant 0 : index
    %146 = vector.load %arg10[%c56, %c0_142] : memref<64x32xf32, #tpu.memory_space<vmem>>, vector<1x32xf32>
    tpu.vector_store %arg10[%c56, %c0_142], %145 {strides = array<i32>} : memref<64x32xf32, #tpu.memory_space<vmem>>, vector<1x32xf32>,
    %c7_143 = arith.constant 7 : index
    %c1_144 = arith.constant 1 : index
    %147 = memref.load %arg0[%c7_143, %c1_144] : memref<8x4xi32, #tpu.memory_space<smem>>
    %148 = arith.index_cast %147 : i32 to index
    %c0_145 = arith.constant 0 : index
    %c0_146 = arith.constant 0 : index
    %149 = vector.load %arg1[%148, %c0_145, %c0_146] : memref<50x1x32xf32, #tpu.memory_space<vmem>>, vector<1x1x32xf32>
    %150 = vector.shape_cast %149 : vector<1x1x32xf32> to vector<1x32xf32>
    %c57 = arith.constant 57 : index
    %c0_147 = arith.constant 0 : index
    %151 = vector.load %arg10[%c57, %c0_147] : memref<64x32xf32, #tpu.memory_space<vmem>>, vector<1x32xf32>
    tpu.vector_store %arg10[%c57, %c0_147], %150 {strides = array<i32>} : memref<64x32xf32, #tpu.memory_space<vmem>>, vector<1x32xf32>,
    %c7_148 = arith.constant 7 : index
    %c2_149 = arith.constant 2 : index
    %152 = memref.load %arg0[%c7_148, %c2_149] : memref<8x4xi32, #tpu.memory_space<smem>>
    %153 = arith.index_cast %152 : i32 to index
    %c0_150 = arith.constant 0 : index
    %c0_151 = arith.constant 0 : index
    %154 = vector.load %arg1[%153, %c0_150, %c0_151] : memref<50x1x32xf32, #tpu.memory_space<vmem>>, vector<1x1x32xf32>
    %155 = vector.shape_cast %154 : vector<1x1x32xf32> to vector<1x32xf32>
    %c58 = arith.constant 58 : index
    %c0_152 = arith.constant 0 : index
    %156 = vector.load %arg10[%c58, %c0_152] : memref<64x32xf32, #tpu.memory_space<vmem>>, vector<1x32xf32>
    tpu.vector_store %arg10[%c58, %c0_152], %155 {strides = array<i32>} : memref<64x32xf32, #tpu.memory_space<vmem>>, vector<1x32xf32>,
    %c7_153 = arith.constant 7 : index
    %c3_154 = arith.constant 3 : index
    %157 = memref.load %arg0[%c7_153, %c3_154] : memref<8x4xi32, #tpu.memory_space<smem>>
    %158 = arith.index_cast %157 : i32 to index
    %c0_155 = arith.constant 0 : index
    %c0_156 = arith.constant 0 : index
    %159 = vector.load %arg1[%158, %c0_155, %c0_156] : memref<50x1x32xf32, #tpu.memory_space<vmem>>, vector<1x1x32xf32>
    %160 = vector.shape_cast %159 : vector<1x1x32xf32> to vector<1x32xf32>
    %c59 = arith.constant 59 : index
    %c0_157 = arith.constant 0 : index
    %161 = vector.load %arg10[%c59, %c0_157] : memref<64x32xf32, #tpu.memory_space<vmem>>, vector<1x32xf32>
    tpu.vector_store %arg10[%c59, %c0_157], %160 {strides = array<i32>} : memref<64x32xf32, #tpu.memory_space<vmem>>, vector<1x32xf32>,
    %c0_158 = arith.constant 0 : index
    %c0_159 = arith.constant 0 : index
    %162 = vector.load %arg10[%c0_158, %c0_159] : memref<64x32xf32, #tpu.memory_space<vmem>>, vector<64x32xf32>
    %c0_160 = arith.constant 0 : index
    %c0_161 = arith.constant 0 : index
    %163 = vector.load %arg2[%c0_160, %c0_161] : memref<32x96xf32, #tpu.memory_space<vmem>>, vector<32x96xf32>
    %cst_162 = arith.constant dense<0.000000e+00> : vector<64x96xf32>
    %164 = tpu.matmul %162, %163, %cst_162 {dimension_numbers = #tpu.dot_dimension_numbers<[1], [0], [0], [1], [0, 0, 1, 1], [], []>} : vector<64x32xf32>, vector<32x96xf32>, vector<64x96xf32> -> vector<64x96xf32>
    %c0_163 = arith.constant 0 : index
    %c0_164 = arith.constant 0 : index
    %165 = vector.load %arg3[%c0_163, %c0_164] : memref<1x96xf32, #tpu.memory_space<vmem>>, vector<1x96xf32>
    %166 = vector.broadcast %165 : vector<1x96xf32> to vector<64x96xf32>
    %167 = arith.addf %164, %166 : vector<64x96xf32>
    %c0_165 = arith.constant 0 : index
    %c0_166 = arith.constant 0 : index
    %168 = vector.load %arg11[%c0_165, %c0_166] : memref<64x96xf32, #tpu.memory_space<vmem>>, vector<64x96xf32>
    tpu.vector_store %arg11[%c0_165, %c0_166], %167 {strides = array<i32>} : memref<64x96xf32, #tpu.memory_space<vmem>>, vector<64x96xf32>,
    %c0_167 = arith.constant 0 : index
    %c0_168 = arith.constant 0 : index
    %169 = vector.load %arg4[%c0_167, %c0_168] : memref<32x96xf32, #tpu.memory_space<vmem>>, vector<32x96xf32>
    %c0_169 = arith.constant 0 : index
    %c0_170 = arith.constant 0 : index
    %170 = vector.load %arg5[%c0_169, %c0_170] : memref<1x96xf32, #tpu.memory_space<vmem>>, vector<1x96xf32>
    %c0_171 = arith.constant 0 : index
    %c0_172 = arith.constant 0 : index
    %171 = vector.load %arg11[%c0_171, %c0_172] : memref<64x96xf32, #tpu.memory_space<vmem>>, vector<8x96xf32>
    %cst_173 = arith.constant 0.000000e+00 : f32
    %172 = vector.broadcast %cst_173 : f32 to vector<8x32xf32>
    %cst_174 = arith.constant dense<0.000000e+00> : vector<8x96xf32>
    %173 = tpu.matmul %172, %169, %cst_174 {dimension_numbers = #tpu.dot_dimension_numbers<[1], [0], [0], [1], [0, 0, 1, 1], [], []>} : vector<8x32xf32>, vector<32x96xf32>, vector<8x96xf32> -> vector<8x96xf32>
    %174 = vector.broadcast %170 : vector<1x96xf32> to vector<8x96xf32>
    %175 = arith.addf %173, %174 : vector<8x96xf32>
    %176 = vector.extract_strided_slice %171 {offsets = [0, 0], sizes = [8, 32], strides = [1, 1]} : vector<8x96xf32> to vector<8x32xf32>
    %177 = vector.extract_strided_slice %175 {offsets = [0, 0], sizes = [8, 32], strides = [1, 1]} : vector<8x96xf32> to vector<8x32xf32>
    %178 = arith.addf %176, %177 : vector<8x32xf32>
    %179 = arith.negf %178 : vector<8x32xf32>
    %180 = math.exp %179 : vector<8x32xf32>
    %cst_175 = arith.constant 1.000000e+00 : f32
    %181 = vector.broadcast %cst_175 : f32 to vector<8x32xf32>
    %182 = arith.addf %181, %180 : vector<8x32xf32>
    %183 = arith.divf %181, %182 : vector<8x32xf32>
    %184 = vector.extract_strided_slice %171 {offsets = [0, 32], sizes = [8, 32], strides = [1, 1]} : vector<8x96xf32> to vector<8x32xf32>
    %185 = vector.extract_strided_slice %175 {offsets = [0, 32], sizes = [8, 32], strides = [1, 1]} : vector<8x96xf32> to vector<8x32xf32>
    %186 = arith.addf %184, %185 : vector<8x32xf32>
    %187 = arith.negf %186 : vector<8x32xf32>
    %188 = math.exp %187 : vector<8x32xf32>
    %cst_176 = arith.constant 1.000000e+00 : f32
    %189 = vector.broadcast %cst_176 : f32 to vector<8x32xf32>
    %190 = arith.addf %189, %188 : vector<8x32xf32>
    %191 = arith.divf %189, %190 : vector<8x32xf32>
    %192 = vector.extract_strided_slice %171 {offsets = [0, 64], sizes = [8, 32], strides = [1, 1]} : vector<8x96xf32> to vector<8x32xf32>
    %193 = vector.extract_strided_slice %175 {offsets = [0, 64], sizes = [8, 32], strides = [1, 1]} : vector<8x96xf32> to vector<8x32xf32>
    %194 = arith.mulf %183, %193 : vector<8x32xf32>
    %195 = arith.addf %192, %194 : vector<8x32xf32>
    %196 = math.tanh %195 : vector<8x32xf32>
    %cst_177 = arith.constant 1.000000e+00 : f32
    %197 = vector.broadcast %cst_177 : f32 to vector<8x32xf32>
    %198 = arith.subf %197, %191 : vector<8x32xf32>
    %199 = arith.mulf %198, %196 : vector<8x32xf32>
    %200 = arith.mulf %191, %172 : vector<8x32xf32>
    %201 = arith.addf %199, %200 : vector<8x32xf32>
    %202 = vector.extract_strided_slice %201 {offsets = [0, 0], sizes = [4, 32], strides = [1, 1]} : vector<8x32xf32> to vector<4x32xf32>
    %c0_178 = arith.constant 0 : index
    %c0_179 = arith.constant 0 : index
    %203 = vector.load %arg8[%c0_178, %c0_179] : memref<4x256xf32, #tpu.memory_space<vmem>>, vector<4x32xf32>
    tpu.vector_store %arg8[%c0_178, %c0_179], %202 {strides = array<i32>} : memref<4x256xf32, #tpu.memory_space<vmem>>, vector<4x32xf32>,
    %c8_180 = arith.constant 8 : index
    %c0_181 = arith.constant 0 : index
    %204 = vector.load %arg11[%c8_180, %c0_181] : memref<64x96xf32, #tpu.memory_space<vmem>>, vector<8x96xf32>
    %cst_182 = arith.constant dense<0.000000e+00> : vector<8x96xf32>
    %205 = tpu.matmul %201, %169, %cst_182 {dimension_numbers = #tpu.dot_dimension_numbers<[1], [0], [0], [1], [0, 0, 1, 1], [], []>} : vector<8x32xf32>, vector<32x96xf32>, vector<8x96xf32> -> vector<8x96xf32>
    %206 = vector.broadcast %170 : vector<1x96xf32> to vector<8x96xf32>
    %207 = arith.addf %205, %206 : vector<8x96xf32>
    %208 = vector.extract_strided_slice %204 {offsets = [0, 0], sizes = [8, 32], strides = [1, 1]} : vector<8x96xf32> to vector<8x32xf32>
    %209 = vector.extract_strided_slice %207 {offsets = [0, 0], sizes = [8, 32], strides = [1, 1]} : vector<8x96xf32> to vector<8x32xf32>
    %210 = arith.addf %208, %209 : vector<8x32xf32>
    %211 = arith.negf %210 : vector<8x32xf32>
    %212 = math.exp %211 : vector<8x32xf32>
    %cst_183 = arith.constant 1.000000e+00 : f32
    %213 = vector.broadcast %cst_183 : f32 to vector<8x32xf32>
    %214 = arith.addf %213, %212 : vector<8x32xf32>
    %215 = arith.divf %213, %214 : vector<8x32xf32>
    %216 = vector.extract_strided_slice %204 {offsets = [0, 32], sizes = [8, 32], strides = [1, 1]} : vector<8x96xf32> to vector<8x32xf32>
    %217 = vector.extract_strided_slice %207 {offsets = [0, 32], sizes = [8, 32], strides = [1, 1]} : vector<8x96xf32> to vector<8x32xf32>
    %218 = arith.addf %216, %217 : vector<8x32xf32>
    %219 = arith.negf %218 : vector<8x32xf32>
    %220 = math.exp %219 : vector<8x32xf32>
    %cst_184 = arith.constant 1.000000e+00 : f32
    %221 = vector.broadcast %cst_184 : f32 to vector<8x32xf32>
    %222 = arith.addf %221, %220 : vector<8x32xf32>
    %223 = arith.divf %221, %222 : vector<8x32xf32>
    %224 = vector.extract_strided_slice %204 {offsets = [0, 64], sizes = [8, 32], strides = [1, 1]} : vector<8x96xf32> to vector<8x32xf32>
    %225 = vector.extract_strided_slice %207 {offsets = [0, 64], sizes = [8, 32], strides = [1, 1]} : vector<8x96xf32> to vector<8x32xf32>
    %226 = arith.mulf %215, %225 : vector<8x32xf32>
    %227 = arith.addf %224, %226 : vector<8x32xf32>
    %228 = math.tanh %227 : vector<8x32xf32>
    %cst_185 = arith.constant 1.000000e+00 : f32
    %229 = vector.broadcast %cst_185 : f32 to vector<8x32xf32>
    %230 = arith.subf %229, %223 : vector<8x32xf32>
    %231 = arith.mulf %230, %228 : vector<8x32xf32>
    %232 = arith.mulf %223, %201 : vector<8x32xf32>
    %233 = arith.addf %231, %232 : vector<8x32xf32>
    %cst_186 = arith.constant dense<0.000000e+00> : vector<8x96xf32>
    %234 = tpu.matmul %233, %169, %cst_186 {dimension_numbers = #tpu.dot_dimension_numbers<[1], [0], [0], [1], [0, 0, 1, 1], [], []>} : vector<8x32xf32>, vector<32x96xf32>, vector<8x96xf32> -> vector<8x96xf32>
    %235 = vector.broadcast %170 : vector<1x96xf32> to vector<8x96xf32>
    %236 = arith.addf %234, %235 : vector<8x96xf32>
    %237 = vector.extract_strided_slice %204 {offsets = [0, 0], sizes = [8, 32], strides = [1, 1]} : vector<8x96xf32> to vector<8x32xf32>
    %238 = vector.extract_strided_slice %236 {offsets = [0, 0], sizes = [8, 32], strides = [1, 1]} : vector<8x96xf32> to vector<8x32xf32>
    %239 = arith.addf %237, %238 : vector<8x32xf32>
    %240 = arith.negf %239 : vector<8x32xf32>
    %241 = math.exp %240 : vector<8x32xf32>
    %cst_187 = arith.constant 1.000000e+00 : f32
    %242 = vector.broadcast %cst_187 : f32 to vector<8x32xf32>
    %243 = arith.addf %242, %241 : vector<8x32xf32>
    %244 = arith.divf %242, %243 : vector<8x32xf32>
    %245 = vector.extract_strided_slice %204 {offsets = [0, 32], sizes = [8, 32], strides = [1, 1]} : vector<8x96xf32> to vector<8x32xf32>
    %246 = vector.extract_strided_slice %236 {offsets = [0, 32], sizes = [8, 32], strides = [1, 1]} : vector<8x96xf32> to vector<8x32xf32>
    %247 = arith.addf %245, %246 : vector<8x32xf32>
    %248 = arith.negf %247 : vector<8x32xf32>
    %249 = math.exp %248 : vector<8x32xf32>
    %cst_188 = arith.constant 1.000000e+00 : f32
    %250 = vector.broadcast %cst_188 : f32 to vector<8x32xf32>
    %251 = arith.addf %250, %249 : vector<8x32xf32>
    %252 = arith.divf %250, %251 : vector<8x32xf32>
    %253 = vector.extract_strided_slice %204 {offsets = [0, 64], sizes = [8, 32], strides = [1, 1]} : vector<8x96xf32> to vector<8x32xf32>
    %254 = vector.extract_strided_slice %236 {offsets = [0, 64], sizes = [8, 32], strides = [1, 1]} : vector<8x96xf32> to vector<8x32xf32>
    %255 = arith.mulf %244, %254 : vector<8x32xf32>
    %256 = arith.addf %253, %255 : vector<8x32xf32>
    %257 = math.tanh %256 : vector<8x32xf32>
    %cst_189 = arith.constant 1.000000e+00 : f32
    %258 = vector.broadcast %cst_189 : f32 to vector<8x32xf32>
    %259 = arith.subf %258, %252 : vector<8x32xf32>
    %260 = arith.mulf %259, %257 : vector<8x32xf32>
    %261 = arith.mulf %252, %233 : vector<8x32xf32>
    %262 = arith.addf %260, %261 : vector<8x32xf32>
    %263 = vector.extract_strided_slice %262 {offsets = [0, 0], sizes = [4, 32], strides = [1, 1]} : vector<8x32xf32> to vector<4x32xf32>
    %c0_190 = arith.constant 0 : index
    %c32_191 = arith.constant 32 : index
    %264 = vector.load %arg8[%c0_190, %c32_191] : memref<4x256xf32, #tpu.memory_space<vmem>>, vector<4x32xf32>
    tpu.vector_store %arg8[%c0_190, %c32_191], %263 {strides = array<i32>} : memref<4x256xf32, #tpu.memory_space<vmem>>, vector<4x32xf32>,
    %c16_192 = arith.constant 16 : index
    %c0_193 = arith.constant 0 : index
    %265 = vector.load %arg11[%c16_192, %c0_193] : memref<64x96xf32, #tpu.memory_space<vmem>>, vector<8x96xf32>
    %cst_194 = arith.constant dense<0.000000e+00> : vector<8x96xf32>
    %266 = tpu.matmul %262, %169, %cst_194 {dimension_numbers = #tpu.dot_dimension_numbers<[1], [0], [0], [1], [0, 0, 1, 1], [], []>} : vector<8x32xf32>, vector<32x96xf32>, vector<8x96xf32> -> vector<8x96xf32>
    %267 = vector.broadcast %170 : vector<1x96xf32> to vector<8x96xf32>
    %268 = arith.addf %266, %267 : vector<8x96xf32>
    %269 = vector.extract_strided_slice %265 {offsets = [0, 0], sizes = [8, 32], strides = [1, 1]} : vector<8x96xf32> to vector<8x32xf32>
    %270 = vector.extract_strided_slice %268 {offsets = [0, 0], sizes = [8, 32], strides = [1, 1]} : vector<8x96xf32> to vector<8x32xf32>
    %271 = arith.addf %269, %270 : vector<8x32xf32>
    %272 = arith.negf %271 : vector<8x32xf32>
    %273 = math.exp %272 : vector<8x32xf32>
    %cst_195 = arith.constant 1.000000e+00 : f32
    %274 = vector.broadcast %cst_195 : f32 to vector<8x32xf32>
    %275 = arith.addf %274, %273 : vector<8x32xf32>
    %276 = arith.divf %274, %275 : vector<8x32xf32>
    %277 = vector.extract_strided_slice %265 {offsets = [0, 32], sizes = [8, 32], strides = [1, 1]} : vector<8x96xf32> to vector<8x32xf32>
    %278 = vector.extract_strided_slice %268 {offsets = [0, 32], sizes = [8, 32], strides = [1, 1]} : vector<8x96xf32> to vector<8x32xf32>
    %279 = arith.addf %277, %278 : vector<8x32xf32>
    %280 = arith.negf %279 : vector<8x32xf32>
    %281 = math.exp %280 : vector<8x32xf32>
    %cst_196 = arith.constant 1.000000e+00 : f32
    %282 = vector.broadcast %cst_196 : f32 to vector<8x32xf32>
    %283 = arith.addf %282, %281 : vector<8x32xf32>
    %284 = arith.divf %282, %283 : vector<8x32xf32>
    %285 = vector.extract_strided_slice %265 {offsets = [0, 64], sizes = [8, 32], strides = [1, 1]} : vector<8x96xf32> to vector<8x32xf32>
    %286 = vector.extract_strided_slice %268 {offsets = [0, 64], sizes = [8, 32], strides = [1, 1]} : vector<8x96xf32> to vector<8x32xf32>
    %287 = arith.mulf %276, %286 : vector<8x32xf32>
    %288 = arith.addf %285, %287 : vector<8x32xf32>
    %289 = math.tanh %288 : vector<8x32xf32>
    %cst_197 = arith.constant 1.000000e+00 : f32
    %290 = vector.broadcast %cst_197 : f32 to vector<8x32xf32>
    %291 = arith.subf %290, %284 : vector<8x32xf32>
    %292 = arith.mulf %291, %289 : vector<8x32xf32>
    %293 = arith.mulf %284, %262 : vector<8x32xf32>
    %294 = arith.addf %292, %293 : vector<8x32xf32>
    %cst_198 = arith.constant dense<0.000000e+00> : vector<8x96xf32>
    %295 = tpu.matmul %294, %169, %cst_198 {dimension_numbers = #tpu.dot_dimension_numbers<[1], [0], [0], [1], [0, 0, 1, 1], [], []>} : vector<8x32xf32>, vector<32x96xf32>, vector<8x96xf32> -> vector<8x96xf32>
    %296 = vector.broadcast %170 : vector<1x96xf32> to vector<8x96xf32>
    %297 = arith.addf %295, %296 : vector<8x96xf32>
    %298 = vector.extract_strided_slice %265 {offsets = [0, 0], sizes = [8, 32], strides = [1, 1]} : vector<8x96xf32> to vector<8x32xf32>
    %299 = vector.extract_strided_slice %297 {offsets = [0, 0], sizes = [8, 32], strides = [1, 1]} : vector<8x96xf32> to vector<8x32xf32>
    %300 = arith.addf %298, %299 : vector<8x32xf32>
    %301 = arith.negf %300 : vector<8x32xf32>
    %302 = math.exp %301 : vector<8x32xf32>
    %cst_199 = arith.constant 1.000000e+00 : f32
    %303 = vector.broadcast %cst_199 : f32 to vector<8x32xf32>
    %304 = arith.addf %303, %302 : vector<8x32xf32>
    %305 = arith.divf %303, %304 : vector<8x32xf32>
    %306 = vector.extract_strided_slice %265 {offsets = [0, 32], sizes = [8, 32], strides = [1, 1]} : vector<8x96xf32> to vector<8x32xf32>
    %307 = vector.extract_strided_slice %297 {offsets = [0, 32], sizes = [8, 32], strides = [1, 1]} : vector<8x96xf32> to vector<8x32xf32>
    %308 = arith.addf %306, %307 : vector<8x32xf32>
    %309 = arith.negf %308 : vector<8x32xf32>
    %310 = math.exp %309 : vector<8x32xf32>
    %cst_200 = arith.constant 1.000000e+00 : f32
    %311 = vector.broadcast %cst_200 : f32 to vector<8x32xf32>
    %312 = arith.addf %311, %310 : vector<8x32xf32>
    %313 = arith.divf %311, %312 : vector<8x32xf32>
    %314 = vector.extract_strided_slice %265 {offsets = [0, 64], sizes = [8, 32], strides = [1, 1]} : vector<8x96xf32> to vector<8x32xf32>
    %315 = vector.extract_strided_slice %297 {offsets = [0, 64], sizes = [8, 32], strides = [1, 1]} : vector<8x96xf32> to vector<8x32xf32>
    %316 = arith.mulf %305, %315 : vector<8x32xf32>
    %317 = arith.addf %314, %316 : vector<8x32xf32>
    %318 = math.tanh %317 : vector<8x32xf32>
    %cst_201 = arith.constant 1.000000e+00 : f32
    %319 = vector.broadcast %cst_201 : f32 to vector<8x32xf32>
    %320 = arith.subf %319, %313 : vector<8x32xf32>
    %321 = arith.mulf %320, %318 : vector<8x32xf32>
    %322 = arith.mulf %313, %294 : vector<8x32xf32>
    %323 = arith.addf %321, %322 : vector<8x32xf32>
    %324 = vector.extract_strided_slice %323 {offsets = [0, 0], sizes = [4, 32], strides = [1, 1]} : vector<8x32xf32> to vector<4x32xf32>
    %c0_202 = arith.constant 0 : index
    %c64 = arith.constant 64 : index
    %325 = vector.load %arg8[%c0_202, %c64] : memref<4x256xf32, #tpu.memory_space<vmem>>, vector<4x32xf32>
    tpu.vector_store %arg8[%c0_202, %c64], %324 {strides = array<i32>} : memref<4x256xf32, #tpu.memory_space<vmem>>, vector<4x32xf32>,
    %c24_203 = arith.constant 24 : index
    %c0_204 = arith.constant 0 : index
    %326 = vector.load %arg11[%c24_203, %c0_204] : memref<64x96xf32, #tpu.memory_space<vmem>>, vector<8x96xf32>
    %cst_205 = arith.constant dense<0.000000e+00> : vector<8x96xf32>
    %327 = tpu.matmul %323, %169, %cst_205 {dimension_numbers = #tpu.dot_dimension_numbers<[1], [0], [0], [1], [0, 0, 1, 1], [], []>} : vector<8x32xf32>, vector<32x96xf32>, vector<8x96xf32> -> vector<8x96xf32>
    %328 = vector.broadcast %170 : vector<1x96xf32> to vector<8x96xf32>
    %329 = arith.addf %327, %328 : vector<8x96xf32>
    %330 = vector.extract_strided_slice %326 {offsets = [0, 0], sizes = [8, 32], strides = [1, 1]} : vector<8x96xf32> to vector<8x32xf32>
    %331 = vector.extract_strided_slice %329 {offsets = [0, 0], sizes = [8, 32], strides = [1, 1]} : vector<8x96xf32> to vector<8x32xf32>
    %332 = arith.addf %330, %331 : vector<8x32xf32>
    %333 = arith.negf %332 : vector<8x32xf32>
    %334 = math.exp %333 : vector<8x32xf32>
    %cst_206 = arith.constant 1.000000e+00 : f32
    %335 = vector.broadcast %cst_206 : f32 to vector<8x32xf32>
    %336 = arith.addf %335, %334 : vector<8x32xf32>
    %337 = arith.divf %335, %336 : vector<8x32xf32>
    %338 = vector.extract_strided_slice %326 {offsets = [0, 32], sizes = [8, 32], strides = [1, 1]} : vector<8x96xf32> to vector<8x32xf32>
    %339 = vector.extract_strided_slice %329 {offsets = [0, 32], sizes = [8, 32], strides = [1, 1]} : vector<8x96xf32> to vector<8x32xf32>
    %340 = arith.addf %338, %339 : vector<8x32xf32>
    %341 = arith.negf %340 : vector<8x32xf32>
    %342 = math.exp %341 : vector<8x32xf32>
    %cst_207 = arith.constant 1.000000e+00 : f32
    %343 = vector.broadcast %cst_207 : f32 to vector<8x32xf32>
    %344 = arith.addf %343, %342 : vector<8x32xf32>
    %345 = arith.divf %343, %344 : vector<8x32xf32>
    %346 = vector.extract_strided_slice %326 {offsets = [0, 64], sizes = [8, 32], strides = [1, 1]} : vector<8x96xf32> to vector<8x32xf32>
    %347 = vector.extract_strided_slice %329 {offsets = [0, 64], sizes = [8, 32], strides = [1, 1]} : vector<8x96xf32> to vector<8x32xf32>
    %348 = arith.mulf %337, %347 : vector<8x32xf32>
    %349 = arith.addf %346, %348 : vector<8x32xf32>
    %350 = math.tanh %349 : vector<8x32xf32>
    %cst_208 = arith.constant 1.000000e+00 : f32
    %351 = vector.broadcast %cst_208 : f32 to vector<8x32xf32>
    %352 = arith.subf %351, %345 : vector<8x32xf32>
    %353 = arith.mulf %352, %350 : vector<8x32xf32>
    %354 = arith.mulf %345, %323 : vector<8x32xf32>
    %355 = arith.addf %353, %354 : vector<8x32xf32>
    %cst_209 = arith.constant dense<0.000000e+00> : vector<8x96xf32>
    %356 = tpu.matmul %355, %169, %cst_209 {dimension_numbers = #tpu.dot_dimension_numbers<[1], [0], [0], [1], [0, 0, 1, 1], [], []>} : vector<8x32xf32>, vector<32x96xf32>, vector<8x96xf32> -> vector<8x96xf32>
    %357 = vector.broadcast %170 : vector<1x96xf32> to vector<8x96xf32>
    %358 = arith.addf %356, %357 : vector<8x96xf32>
    %359 = vector.extract_strided_slice %326 {offsets = [0, 0], sizes = [8, 32], strides = [1, 1]} : vector<8x96xf32> to vector<8x32xf32>
    %360 = vector.extract_strided_slice %358 {offsets = [0, 0], sizes = [8, 32], strides = [1, 1]} : vector<8x96xf32> to vector<8x32xf32>
    %361 = arith.addf %359, %360 : vector<8x32xf32>
    %362 = arith.negf %361 : vector<8x32xf32>
    %363 = math.exp %362 : vector<8x32xf32>
    %cst_210 = arith.constant 1.000000e+00 : f32
    %364 = vector.broadcast %cst_210 : f32 to vector<8x32xf32>
    %365 = arith.addf %364, %363 : vector<8x32xf32>
    %366 = arith.divf %364, %365 : vector<8x32xf32>
    %367 = vector.extract_strided_slice %326 {offsets = [0, 32], sizes = [8, 32], strides = [1, 1]} : vector<8x96xf32> to vector<8x32xf32>
    %368 = vector.extract_strided_slice %358 {offsets = [0, 32], sizes = [8, 32], strides = [1, 1]} : vector<8x96xf32> to vector<8x32xf32>
    %369 = arith.addf %367, %368 : vector<8x32xf32>
    %370 = arith.negf %369 : vector<8x32xf32>
    %371 = math.exp %370 : vector<8x32xf32>
    %cst_211 = arith.constant 1.000000e+00 : f32
    %372 = vector.broadcast %cst_211 : f32 to vector<8x32xf32>
    %373 = arith.addf %372, %371 : vector<8x32xf32>
    %374 = arith.divf %372, %373 : vector<8x32xf32>
    %375 = vector.extract_strided_slice %326 {offsets = [0, 64], sizes = [8, 32], strides = [1, 1]} : vector<8x96xf32> to vector<8x32xf32>
    %376 = vector.extract_strided_slice %358 {offsets = [0, 64], sizes = [8, 32], strides = [1, 1]} : vector<8x96xf32> to vector<8x32xf32>
    %377 = arith.mulf %366, %376 : vector<8x32xf32>
    %378 = arith.addf %375, %377 : vector<8x32xf32>
    %379 = math.tanh %378 : vector<8x32xf32>
    %cst_212 = arith.constant 1.000000e+00 : f32
    %380 = vector.broadcast %cst_212 : f32 to vector<8x32xf32>
    %381 = arith.subf %380, %374 : vector<8x32xf32>
    %382 = arith.mulf %381, %379 : vector<8x32xf32>
    %383 = arith.mulf %374, %355 : vector<8x32xf32>
    %384 = arith.addf %382, %383 : vector<8x32xf32>
    %385 = vector.extract_strided_slice %384 {offsets = [0, 0], sizes = [4, 32], strides = [1, 1]} : vector<8x32xf32> to vector<4x32xf32>
    %c0_213 = arith.constant 0 : index
    %c96 = arith.constant 96 : index
    %386 = vector.load %arg8[%c0_213, %c96] : memref<4x256xf32, #tpu.memory_space<vmem>>, vector<4x32xf32>
    tpu.vector_store %arg8[%c0_213, %c96], %385 {strides = array<i32>} : memref<4x256xf32, #tpu.memory_space<vmem>>, vector<4x32xf32>,
    %c32_214 = arith.constant 32 : index
    %c0_215 = arith.constant 0 : index
    %387 = vector.load %arg11[%c32_214, %c0_215] : memref<64x96xf32, #tpu.memory_space<vmem>>, vector<8x96xf32>
    %cst_216 = arith.constant dense<0.000000e+00> : vector<8x96xf32>
    %388 = tpu.matmul %384, %169, %cst_216 {dimension_numbers = #tpu.dot_dimension_numbers<[1], [0], [0], [1], [0, 0, 1, 1], [], []>} : vector<8x32xf32>, vector<32x96xf32>, vector<8x96xf32> -> vector<8x96xf32>
    %389 = vector.broadcast %170 : vector<1x96xf32> to vector<8x96xf32>
    %390 = arith.addf %388, %389 : vector<8x96xf32>
    %391 = vector.extract_strided_slice %387 {offsets = [0, 0], sizes = [8, 32], strides = [1, 1]} : vector<8x96xf32> to vector<8x32xf32>
    %392 = vector.extract_strided_slice %390 {offsets = [0, 0], sizes = [8, 32], strides = [1, 1]} : vector<8x96xf32> to vector<8x32xf32>
    %393 = arith.addf %391, %392 : vector<8x32xf32>
    %394 = arith.negf %393 : vector<8x32xf32>
    %395 = math.exp %394 : vector<8x32xf32>
    %cst_217 = arith.constant 1.000000e+00 : f32
    %396 = vector.broadcast %cst_217 : f32 to vector<8x32xf32>
    %397 = arith.addf %396, %395 : vector<8x32xf32>
    %398 = arith.divf %396, %397 : vector<8x32xf32>
    %399 = vector.extract_strided_slice %387 {offsets = [0, 32], sizes = [8, 32], strides = [1, 1]} : vector<8x96xf32> to vector<8x32xf32>
    %400 = vector.extract_strided_slice %390 {offsets = [0, 32], sizes = [8, 32], strides = [1, 1]} : vector<8x96xf32> to vector<8x32xf32>
    %401 = arith.addf %399, %400 : vector<8x32xf32>
    %402 = arith.negf %401 : vector<8x32xf32>
    %403 = math.exp %402 : vector<8x32xf32>
    %cst_218 = arith.constant 1.000000e+00 : f32
    %404 = vector.broadcast %cst_218 : f32 to vector<8x32xf32>
    %405 = arith.addf %404, %403 : vector<8x32xf32>
    %406 = arith.divf %404, %405 : vector<8x32xf32>
    %407 = vector.extract_strided_slice %387 {offsets = [0, 64], sizes = [8, 32], strides = [1, 1]} : vector<8x96xf32> to vector<8x32xf32>
    %408 = vector.extract_strided_slice %390 {offsets = [0, 64], sizes = [8, 32], strides = [1, 1]} : vector<8x96xf32> to vector<8x32xf32>
    %409 = arith.mulf %398, %408 : vector<8x32xf32>
    %410 = arith.addf %407, %409 : vector<8x32xf32>
    %411 = math.tanh %410 : vector<8x32xf32>
    %cst_219 = arith.constant 1.000000e+00 : f32
    %412 = vector.broadcast %cst_219 : f32 to vector<8x32xf32>
    %413 = arith.subf %412, %406 : vector<8x32xf32>
    %414 = arith.mulf %413, %411 : vector<8x32xf32>
    %415 = arith.mulf %406, %384 : vector<8x32xf32>
    %416 = arith.addf %414, %415 : vector<8x32xf32>
    %cst_220 = arith.constant dense<0.000000e+00> : vector<8x96xf32>
    %417 = tpu.matmul %416, %169, %cst_220 {dimension_numbers = #tpu.dot_dimension_numbers<[1], [0], [0], [1], [0, 0, 1, 1], [], []>} : vector<8x32xf32>, vector<32x96xf32>, vector<8x96xf32> -> vector<8x96xf32>
    %418 = vector.broadcast %170 : vector<1x96xf32> to vector<8x96xf32>
    %419 = arith.addf %417, %418 : vector<8x96xf32>
    %420 = vector.extract_strided_slice %387 {offsets = [0, 0], sizes = [8, 32], strides = [1, 1]} : vector<8x96xf32> to vector<8x32xf32>
    %421 = vector.extract_strided_slice %419 {offsets = [0, 0], sizes = [8, 32], strides = [1, 1]} : vector<8x96xf32> to vector<8x32xf32>
    %422 = arith.addf %420, %421 : vector<8x32xf32>
    %423 = arith.negf %422 : vector<8x32xf32>
    %424 = math.exp %423 : vector<8x32xf32>
    %cst_221 = arith.constant 1.000000e+00 : f32
    %425 = vector.broadcast %cst_221 : f32 to vector<8x32xf32>
    %426 = arith.addf %425, %424 : vector<8x32xf32>
    %427 = arith.divf %425, %426 : vector<8x32xf32>
    %428 = vector.extract_strided_slice %387 {offsets = [0, 32], sizes = [8, 32], strides = [1, 1]} : vector<8x96xf32> to vector<8x32xf32>
    %429 = vector.extract_strided_slice %419 {offsets = [0, 32], sizes = [8, 32], strides = [1, 1]} : vector<8x96xf32> to vector<8x32xf32>
    %430 = arith.addf %428, %429 : vector<8x32xf32>
    %431 = arith.negf %430 : vector<8x32xf32>
    %432 = math.exp %431 : vector<8x32xf32>
    %cst_222 = arith.constant 1.000000e+00 : f32
    %433 = vector.broadcast %cst_222 : f32 to vector<8x32xf32>
    %434 = arith.addf %433, %432 : vector<8x32xf32>
    %435 = arith.divf %433, %434 : vector<8x32xf32>
    %436 = vector.extract_strided_slice %387 {offsets = [0, 64], sizes = [8, 32], strides = [1, 1]} : vector<8x96xf32> to vector<8x32xf32>
    %437 = vector.extract_strided_slice %419 {offsets = [0, 64], sizes = [8, 32], strides = [1, 1]} : vector<8x96xf32> to vector<8x32xf32>
    %438 = arith.mulf %427, %437 : vector<8x32xf32>
    %439 = arith.addf %436, %438 : vector<8x32xf32>
    %440 = math.tanh %439 : vector<8x32xf32>
    %cst_223 = arith.constant 1.000000e+00 : f32
    %441 = vector.broadcast %cst_223 : f32 to vector<8x32xf32>
    %442 = arith.subf %441, %435 : vector<8x32xf32>
    %443 = arith.mulf %442, %440 : vector<8x32xf32>
    %444 = arith.mulf %435, %416 : vector<8x32xf32>
    %445 = arith.addf %443, %444 : vector<8x32xf32>
    %446 = vector.extract_strided_slice %445 {offsets = [0, 0], sizes = [4, 32], strides = [1, 1]} : vector<8x32xf32> to vector<4x32xf32>
    %c0_224 = arith.constant 0 : index
    %c128 = arith.constant 128 : index
    %447 = vector.load %arg8[%c0_224, %c128] : memref<4x256xf32, #tpu.memory_space<vmem>>, vector<4x32xf32>
    tpu.vector_store %arg8[%c0_224, %c128], %446 {strides = array<i32>} : memref<4x256xf32, #tpu.memory_space<vmem>>, vector<4x32xf32>,
    %c40_225 = arith.constant 40 : index
    %c0_226 = arith.constant 0 : index
    %448 = vector.load %arg11[%c40_225, %c0_226] : memref<64x96xf32, #tpu.memory_space<vmem>>, vector<8x96xf32>
    %cst_227 = arith.constant dense<0.000000e+00> : vector<8x96xf32>
    %449 = tpu.matmul %445, %169, %cst_227 {dimension_numbers = #tpu.dot_dimension_numbers<[1], [0], [0], [1], [0, 0, 1, 1], [], []>} : vector<8x32xf32>, vector<32x96xf32>, vector<8x96xf32> -> vector<8x96xf32>
    %450 = vector.broadcast %170 : vector<1x96xf32> to vector<8x96xf32>
    %451 = arith.addf %449, %450 : vector<8x96xf32>
    %452 = vector.extract_strided_slice %448 {offsets = [0, 0], sizes = [8, 32], strides = [1, 1]} : vector<8x96xf32> to vector<8x32xf32>
    %453 = vector.extract_strided_slice %451 {offsets = [0, 0], sizes = [8, 32], strides = [1, 1]} : vector<8x96xf32> to vector<8x32xf32>
    %454 = arith.addf %452, %453 : vector<8x32xf32>
    %455 = arith.negf %454 : vector<8x32xf32>
    %456 = math.exp %455 : vector<8x32xf32>
    %cst_228 = arith.constant 1.000000e+00 : f32
    %457 = vector.broadcast %cst_228 : f32 to vector<8x32xf32>
    %458 = arith.addf %457, %456 : vector<8x32xf32>
    %459 = arith.divf %457, %458 : vector<8x32xf32>
    %460 = vector.extract_strided_slice %448 {offsets = [0, 32], sizes = [8, 32], strides = [1, 1]} : vector<8x96xf32> to vector<8x32xf32>
    %461 = vector.extract_strided_slice %451 {offsets = [0, 32], sizes = [8, 32], strides = [1, 1]} : vector<8x96xf32> to vector<8x32xf32>
    %462 = arith.addf %460, %461 : vector<8x32xf32>
    %463 = arith.negf %462 : vector<8x32xf32>
    %464 = math.exp %463 : vector<8x32xf32>
    %cst_229 = arith.constant 1.000000e+00 : f32
    %465 = vector.broadcast %cst_229 : f32 to vector<8x32xf32>
    %466 = arith.addf %465, %464 : vector<8x32xf32>
    %467 = arith.divf %465, %466 : vector<8x32xf32>
    %468 = vector.extract_strided_slice %448 {offsets = [0, 64], sizes = [8, 32], strides = [1, 1]} : vector<8x96xf32> to vector<8x32xf32>
    %469 = vector.extract_strided_slice %451 {offsets = [0, 64], sizes = [8, 32], strides = [1, 1]} : vector<8x96xf32> to vector<8x32xf32>
    %470 = arith.mulf %459, %469 : vector<8x32xf32>
    %471 = arith.addf %468, %470 : vector<8x32xf32>
    %472 = math.tanh %471 : vector<8x32xf32>
    %cst_230 = arith.constant 1.000000e+00 : f32
    %473 = vector.broadcast %cst_230 : f32 to vector<8x32xf32>
    %474 = arith.subf %473, %467 : vector<8x32xf32>
    %475 = arith.mulf %474, %472 : vector<8x32xf32>
    %476 = arith.mulf %467, %445 : vector<8x32xf32>
    %477 = arith.addf %475, %476 : vector<8x32xf32>
    %cst_231 = arith.constant dense<0.000000e+00> : vector<8x96xf32>
    %478 = tpu.matmul %477, %169, %cst_231 {dimension_numbers = #tpu.dot_dimension_numbers<[1], [0], [0], [1], [0, 0, 1, 1], [], []>} : vector<8x32xf32>, vector<32x96xf32>, vector<8x96xf32> -> vector<8x96xf32>
    %479 = vector.broadcast %170 : vector<1x96xf32> to vector<8x96xf32>
    %480 = arith.addf %478, %479 : vector<8x96xf32>
    %481 = vector.extract_strided_slice %448 {offsets = [0, 0], sizes = [8, 32], strides = [1, 1]} : vector<8x96xf32> to vector<8x32xf32>
    %482 = vector.extract_strided_slice %480 {offsets = [0, 0], sizes = [8, 32], strides = [1, 1]} : vector<8x96xf32> to vector<8x32xf32>
    %483 = arith.addf %481, %482 : vector<8x32xf32>
    %484 = arith.negf %483 : vector<8x32xf32>
    %485 = math.exp %484 : vector<8x32xf32>
    %cst_232 = arith.constant 1.000000e+00 : f32
    %486 = vector.broadcast %cst_232 : f32 to vector<8x32xf32>
    %487 = arith.addf %486, %485 : vector<8x32xf32>
    %488 = arith.divf %486, %487 : vector<8x32xf32>
    %489 = vector.extract_strided_slice %448 {offsets = [0, 32], sizes = [8, 32], strides = [1, 1]} : vector<8x96xf32> to vector<8x32xf32>
    %490 = vector.extract_strided_slice %480 {offsets = [0, 32], sizes = [8, 32], strides = [1, 1]} : vector<8x96xf32> to vector<8x32xf32>
    %491 = arith.addf %489, %490 : vector<8x32xf32>
    %492 = arith.negf %491 : vector<8x32xf32>
    %493 = math.exp %492 : vector<8x32xf32>
    %cst_233 = arith.constant 1.000000e+00 : f32
    %494 = vector.broadcast %cst_233 : f32 to vector<8x32xf32>
    %495 = arith.addf %494, %493 : vector<8x32xf32>
    %496 = arith.divf %494, %495 : vector<8x32xf32>
    %497 = vector.extract_strided_slice %448 {offsets = [0, 64], sizes = [8, 32], strides = [1, 1]} : vector<8x96xf32> to vector<8x32xf32>
    %498 = vector.extract_strided_slice %480 {offsets = [0, 64], sizes = [8, 32], strides = [1, 1]} : vector<8x96xf32> to vector<8x32xf32>
    %499 = arith.mulf %488, %498 : vector<8x32xf32>
    %500 = arith.addf %497, %499 : vector<8x32xf32>
    %501 = math.tanh %500 : vector<8x32xf32>
    %cst_234 = arith.constant 1.000000e+00 : f32
    %502 = vector.broadcast %cst_234 : f32 to vector<8x32xf32>
    %503 = arith.subf %502, %496 : vector<8x32xf32>
    %504 = arith.mulf %503, %501 : vector<8x32xf32>
    %505 = arith.mulf %496, %477 : vector<8x32xf32>
    %506 = arith.addf %504, %505 : vector<8x32xf32>
    %507 = vector.extract_strided_slice %506 {offsets = [0, 0], sizes = [4, 32], strides = [1, 1]} : vector<8x32xf32> to vector<4x32xf32>
    %c0_235 = arith.constant 0 : index
    %c160 = arith.constant 160 : index
    %508 = vector.load %arg8[%c0_235, %c160] : memref<4x256xf32, #tpu.memory_space<vmem>>, vector<4x32xf32>
    tpu.vector_store %arg8[%c0_235, %c160], %507 {strides = array<i32>} : memref<4x256xf32, #tpu.memory_space<vmem>>, vector<4x32xf32>,
    %c48_236 = arith.constant 48 : index
    %c0_237 = arith.constant 0 : index
    %509 = vector.load %arg11[%c48_236, %c0_237] : memref<64x96xf32, #tpu.memory_space<vmem>>, vector<8x96xf32>
    %cst_238 = arith.constant dense<0.000000e+00> : vector<8x96xf32>
    %510 = tpu.matmul %506, %169, %cst_238 {dimension_numbers = #tpu.dot_dimension_numbers<[1], [0], [0], [1], [0, 0, 1, 1], [], []>} : vector<8x32xf32>, vector<32x96xf32>, vector<8x96xf32> -> vector<8x96xf32>
    %511 = vector.broadcast %170 : vector<1x96xf32> to vector<8x96xf32>
    %512 = arith.addf %510, %511 : vector<8x96xf32>
    %513 = vector.extract_strided_slice %509 {offsets = [0, 0], sizes = [8, 32], strides = [1, 1]} : vector<8x96xf32> to vector<8x32xf32>
    %514 = vector.extract_strided_slice %512 {offsets = [0, 0], sizes = [8, 32], strides = [1, 1]} : vector<8x96xf32> to vector<8x32xf32>
    %515 = arith.addf %513, %514 : vector<8x32xf32>
    %516 = arith.negf %515 : vector<8x32xf32>
    %517 = math.exp %516 : vector<8x32xf32>
    %cst_239 = arith.constant 1.000000e+00 : f32
    %518 = vector.broadcast %cst_239 : f32 to vector<8x32xf32>
    %519 = arith.addf %518, %517 : vector<8x32xf32>
    %520 = arith.divf %518, %519 : vector<8x32xf32>
    %521 = vector.extract_strided_slice %509 {offsets = [0, 32], sizes = [8, 32], strides = [1, 1]} : vector<8x96xf32> to vector<8x32xf32>
    %522 = vector.extract_strided_slice %512 {offsets = [0, 32], sizes = [8, 32], strides = [1, 1]} : vector<8x96xf32> to vector<8x32xf32>
    %523 = arith.addf %521, %522 : vector<8x32xf32>
    %524 = arith.negf %523 : vector<8x32xf32>
    %525 = math.exp %524 : vector<8x32xf32>
    %cst_240 = arith.constant 1.000000e+00 : f32
    %526 = vector.broadcast %cst_240 : f32 to vector<8x32xf32>
    %527 = arith.addf %526, %525 : vector<8x32xf32>
    %528 = arith.divf %526, %527 : vector<8x32xf32>
    %529 = vector.extract_strided_slice %509 {offsets = [0, 64], sizes = [8, 32], strides = [1, 1]} : vector<8x96xf32> to vector<8x32xf32>
    %530 = vector.extract_strided_slice %512 {offsets = [0, 64], sizes = [8, 32], strides = [1, 1]} : vector<8x96xf32> to vector<8x32xf32>
    %531 = arith.mulf %520, %530 : vector<8x32xf32>
    %532 = arith.addf %529, %531 : vector<8x32xf32>
    %533 = math.tanh %532 : vector<8x32xf32>
    %cst_241 = arith.constant 1.000000e+00 : f32
    %534 = vector.broadcast %cst_241 : f32 to vector<8x32xf32>
    %535 = arith.subf %534, %528 : vector<8x32xf32>
    %536 = arith.mulf %535, %533 : vector<8x32xf32>
    %537 = arith.mulf %528, %506 : vector<8x32xf32>
    %538 = arith.addf %536, %537 : vector<8x32xf32>
    %cst_242 = arith.constant dense<0.000000e+00> : vector<8x96xf32>
    %539 = tpu.matmul %538, %169, %cst_242 {dimension_numbers = #tpu.dot_dimension_numbers<[1], [0], [0], [1], [0, 0, 1, 1], [], []>} : vector<8x32xf32>, vector<32x96xf32>, vector<8x96xf32> -> vector<8x96xf32>
    %540 = vector.broadcast %170 : vector<1x96xf32> to vector<8x96xf32>
    %541 = arith.addf %539, %540 : vector<8x96xf32>
    %542 = vector.extract_strided_slice %509 {offsets = [0, 0], sizes = [8, 32], strides = [1, 1]} : vector<8x96xf32> to vector<8x32xf32>
    %543 = vector.extract_strided_slice %541 {offsets = [0, 0], sizes = [8, 32], strides = [1, 1]} : vector<8x96xf32> to vector<8x32xf32>
    %544 = arith.addf %542, %543 : vector<8x32xf32>
    %545 = arith.negf %544 : vector<8x32xf32>
    %546 = math.exp %545 : vector<8x32xf32>
    %cst_243 = arith.constant 1.000000e+00 : f32
    %547 = vector.broadcast %cst_243 : f32 to vector<8x32xf32>
    %548 = arith.addf %547, %546 : vector<8x32xf32>
    %549 = arith.divf %547, %548 : vector<8x32xf32>
    %550 = vector.extract_strided_slice %509 {offsets = [0, 32], sizes = [8, 32], strides = [1, 1]} : vector<8x96xf32> to vector<8x32xf32>
    %551 = vector.extract_strided_slice %541 {offsets = [0, 32], sizes = [8, 32], strides = [1, 1]} : vector<8x96xf32> to vector<8x32xf32>
    %552 = arith.addf %550, %551 : vector<8x32xf32>
    %553 = arith.negf %552 : vector<8x32xf32>
    %554 = math.exp %553 : vector<8x32xf32>
    %cst_244 = arith.constant 1.000000e+00 : f32
    %555 = vector.broadcast %cst_244 : f32 to vector<8x32xf32>
    %556 = arith.addf %555, %554 : vector<8x32xf32>
    %557 = arith.divf %555, %556 : vector<8x32xf32>
    %558 = vector.extract_strided_slice %509 {offsets = [0, 64], sizes = [8, 32], strides = [1, 1]} : vector<8x96xf32> to vector<8x32xf32>
    %559 = vector.extract_strided_slice %541 {offsets = [0, 64], sizes = [8, 32], strides = [1, 1]} : vector<8x96xf32> to vector<8x32xf32>
    %560 = arith.mulf %549, %559 : vector<8x32xf32>
    %561 = arith.addf %558, %560 : vector<8x32xf32>
    %562 = math.tanh %561 : vector<8x32xf32>
    %cst_245 = arith.constant 1.000000e+00 : f32
    %563 = vector.broadcast %cst_245 : f32 to vector<8x32xf32>
    %564 = arith.subf %563, %557 : vector<8x32xf32>
    %565 = arith.mulf %564, %562 : vector<8x32xf32>
    %566 = arith.mulf %557, %538 : vector<8x32xf32>
    %567 = arith.addf %565, %566 : vector<8x32xf32>
    %568 = vector.extract_strided_slice %567 {offsets = [0, 0], sizes = [4, 32], strides = [1, 1]} : vector<8x32xf32> to vector<4x32xf32>
    %c0_246 = arith.constant 0 : index
    %c192 = arith.constant 192 : index
    %569 = vector.load %arg8[%c0_246, %c192] : memref<4x256xf32, #tpu.memory_space<vmem>>, vector<4x32xf32>
    tpu.vector_store %arg8[%c0_246, %c192], %568 {strides = array<i32>} : memref<4x256xf32, #tpu.memory_space<vmem>>, vector<4x32xf32>,
    %c56_247 = arith.constant 56 : index
    %c0_248 = arith.constant 0 : index
    %570 = vector.load %arg11[%c56_247, %c0_248] : memref<64x96xf32, #tpu.memory_space<vmem>>, vector<8x96xf32>
    %cst_249 = arith.constant dense<0.000000e+00> : vector<8x96xf32>
    %571 = tpu.matmul %567, %169, %cst_249 {dimension_numbers = #tpu.dot_dimension_numbers<[1], [0], [0], [1], [0, 0, 1, 1], [], []>} : vector<8x32xf32>, vector<32x96xf32>, vector<8x96xf32> -> vector<8x96xf32>
    %572 = vector.broadcast %170 : vector<1x96xf32> to vector<8x96xf32>
    %573 = arith.addf %571, %572 : vector<8x96xf32>
    %574 = vector.extract_strided_slice %570 {offsets = [0, 0], sizes = [8, 32], strides = [1, 1]} : vector<8x96xf32> to vector<8x32xf32>
    %575 = vector.extract_strided_slice %573 {offsets = [0, 0], sizes = [8, 32], strides = [1, 1]} : vector<8x96xf32> to vector<8x32xf32>
    %576 = arith.addf %574, %575 : vector<8x32xf32>
    %577 = arith.negf %576 : vector<8x32xf32>
    %578 = math.exp %577 : vector<8x32xf32>
    %cst_250 = arith.constant 1.000000e+00 : f32
    %579 = vector.broadcast %cst_250 : f32 to vector<8x32xf32>
    %580 = arith.addf %579, %578 : vector<8x32xf32>
    %581 = arith.divf %579, %580 : vector<8x32xf32>
    %582 = vector.extract_strided_slice %570 {offsets = [0, 32], sizes = [8, 32], strides = [1, 1]} : vector<8x96xf32> to vector<8x32xf32>
    %583 = vector.extract_strided_slice %573 {offsets = [0, 32], sizes = [8, 32], strides = [1, 1]} : vector<8x96xf32> to vector<8x32xf32>
    %584 = arith.addf %582, %583 : vector<8x32xf32>
    %585 = arith.negf %584 : vector<8x32xf32>
    %586 = math.exp %585 : vector<8x32xf32>
    %cst_251 = arith.constant 1.000000e+00 : f32
    %587 = vector.broadcast %cst_251 : f32 to vector<8x32xf32>
    %588 = arith.addf %587, %586 : vector<8x32xf32>
    %589 = arith.divf %587, %588 : vector<8x32xf32>
    %590 = vector.extract_strided_slice %570 {offsets = [0, 64], sizes = [8, 32], strides = [1, 1]} : vector<8x96xf32> to vector<8x32xf32>
    %591 = vector.extract_strided_slice %573 {offsets = [0, 64], sizes = [8, 32], strides = [1, 1]} : vector<8x96xf32> to vector<8x32xf32>
    %592 = arith.mulf %581, %591 : vector<8x32xf32>
    %593 = arith.addf %590, %592 : vector<8x32xf32>
    %594 = math.tanh %593 : vector<8x32xf32>
    %cst_252 = arith.constant 1.000000e+00 : f32
    %595 = vector.broadcast %cst_252 : f32 to vector<8x32xf32>
    %596 = arith.subf %595, %589 : vector<8x32xf32>
    %597 = arith.mulf %596, %594 : vector<8x32xf32>
    %598 = arith.mulf %589, %567 : vector<8x32xf32>
    %599 = arith.addf %597, %598 : vector<8x32xf32>
    %cst_253 = arith.constant dense<0.000000e+00> : vector<8x96xf32>
    %600 = tpu.matmul %599, %169, %cst_253 {dimension_numbers = #tpu.dot_dimension_numbers<[1], [0], [0], [1], [0, 0, 1, 1], [], []>} : vector<8x32xf32>, vector<32x96xf32>, vector<8x96xf32> -> vector<8x96xf32>
    %601 = vector.broadcast %170 : vector<1x96xf32> to vector<8x96xf32>
    %602 = arith.addf %600, %601 : vector<8x96xf32>
    %603 = vector.extract_strided_slice %570 {offsets = [0, 0], sizes = [8, 32], strides = [1, 1]} : vector<8x96xf32> to vector<8x32xf32>
    %604 = vector.extract_strided_slice %602 {offsets = [0, 0], sizes = [8, 32], strides = [1, 1]} : vector<8x96xf32> to vector<8x32xf32>
    %605 = arith.addf %603, %604 : vector<8x32xf32>
    %606 = arith.negf %605 : vector<8x32xf32>
    %607 = math.exp %606 : vector<8x32xf32>
    %cst_254 = arith.constant 1.000000e+00 : f32
    %608 = vector.broadcast %cst_254 : f32 to vector<8x32xf32>
    %609 = arith.addf %608, %607 : vector<8x32xf32>
    %610 = arith.divf %608, %609 : vector<8x32xf32>
    %611 = vector.extract_strided_slice %570 {offsets = [0, 32], sizes = [8, 32], strides = [1, 1]} : vector<8x96xf32> to vector<8x32xf32>
    %612 = vector.extract_strided_slice %602 {offsets = [0, 32], sizes = [8, 32], strides = [1, 1]} : vector<8x96xf32> to vector<8x32xf32>
    %613 = arith.addf %611, %612 : vector<8x32xf32>
    %614 = arith.negf %613 : vector<8x32xf32>
    %615 = math.exp %614 : vector<8x32xf32>
    %cst_255 = arith.constant 1.000000e+00 : f32
    %616 = vector.broadcast %cst_255 : f32 to vector<8x32xf32>
    %617 = arith.addf %616, %615 : vector<8x32xf32>
    %618 = arith.divf %616, %617 : vector<8x32xf32>
    %619 = vector.extract_strided_slice %570 {offsets = [0, 64], sizes = [8, 32], strides = [1, 1]} : vector<8x96xf32> to vector<8x32xf32>
    %620 = vector.extract_strided_slice %602 {offsets = [0, 64], sizes = [8, 32], strides = [1, 1]} : vector<8x96xf32> to vector<8x32xf32>
    %621 = arith.mulf %610, %620 : vector<8x32xf32>
    %622 = arith.addf %619, %621 : vector<8x32xf32>
    %623 = math.tanh %622 : vector<8x32xf32>
    %cst_256 = arith.constant 1.000000e+00 : f32
    %624 = vector.broadcast %cst_256 : f32 to vector<8x32xf32>
    %625 = arith.subf %624, %618 : vector<8x32xf32>
    %626 = arith.mulf %625, %623 : vector<8x32xf32>
    %627 = arith.mulf %618, %599 : vector<8x32xf32>
    %628 = arith.addf %626, %627 : vector<8x32xf32>
    %629 = vector.extract_strided_slice %628 {offsets = [0, 0], sizes = [4, 32], strides = [1, 1]} : vector<8x32xf32> to vector<4x32xf32>
    %c0_257 = arith.constant 0 : index
    %c224 = arith.constant 224 : index
    %630 = vector.load %arg8[%c0_257, %c224] : memref<4x256xf32, #tpu.memory_space<vmem>>, vector<4x32xf32>
    tpu.vector_store %arg8[%c0_257, %c224], %629 {strides = array<i32>} : memref<4x256xf32, #tpu.memory_space<vmem>>, vector<4x32xf32>,
    %c0_258 = arith.constant 0 : index
    %c0_259 = arith.constant 0 : index
    %631 = vector.load %arg6[%c0_258, %c0_259] : memref<32x10xf32, #tpu.memory_space<vmem>>, vector<32x10xf32>
    %cst_260 = arith.constant dense<0.000000e+00> : vector<8x10xf32>
    %632 = tpu.matmul %628, %631, %cst_260 {dimension_numbers = #tpu.dot_dimension_numbers<[1], [0], [0], [1], [0, 0, 1, 1], [], []>} : vector<8x32xf32>, vector<32x10xf32>, vector<8x10xf32> -> vector<8x10xf32>
    %c0_261 = arith.constant 0 : index
    %c0_262 = arith.constant 0 : index
    %633 = vector.load %arg7[%c0_261, %c0_262] : memref<1x10xf32, #tpu.memory_space<vmem>>, vector<1x10xf32>
    %634 = vector.broadcast %633 : vector<1x10xf32> to vector<8x10xf32>
    %635 = arith.addf %632, %634 : vector<8x10xf32>
    %636 = vector.extract_strided_slice %635 {offsets = [0, 0], sizes = [4, 10], strides = [1, 1]} : vector<8x10xf32> to vector<4x10xf32>
    %c0_263 = arith.constant 0 : index
    %c0_264 = arith.constant 0 : index
    %637 = vector.load %arg9[%c0_263, %c0_264] : memref<4x10xf32, #tpu.memory_space<vmem>>, vector<4x10xf32>
    tpu.vector_store %arg9[%c0_263, %c0_264], %636 {strides = array<i32>} : memref<4x10xf32, #tpu.memory_space<vmem>>, vector<4x10xf32>,
    return
  }
}

</mosaic_0001>

<bundles_post_ra>
// kernel: gru_forward.1
= control target key start
LH: loop header
LB: loop body
LE: loop exit
PB: predicated region body
PF: predicated region fallthrough
CT: control target
= control target key end

     0   :  { %15 = vsyncpa [#allocation6], 0  ;;  %s3199_s0 = inlined_call_operand.vmem [shape: s32[8,4], index: 0, kind: input, shape index: {}]   ;;  %s3200_s1 = inlined_call_operand.vmem [shape: f32[50,1,32], index: 1, kind: input, shape index: {}]   ;;  %s3201_s2 = inlined_call_operand.vmem [shape: f32[32,96], index: 2, kind: input, shape index: {}]   ;;  %s3202_s3 = inlined_call_operand.vmem [shape: f32[1,96], index: 3, kind: input, shape index: {}]   ;;  %s3203_s4 = inlined_call_operand.vmem [shape: f32[32,96], index: 4, kind: input, shape index: {}]   ;;  %s3204_s5 = inlined_call_operand.vmem [shape: f32[1,96], index: 5, kind: input, shape index: {}]   ;;  %s3205_s6 = inlined_call_operand.vmem [shape: f32[32,10], index: 6, kind: input, shape index: {}]   ;;  %s3206_s7 = inlined_call_operand.vmem [shape: f32[1,10], index: 7, kind: input, shape index: {}]   ;;  %s3207_s8 = inlined_call_operand.hbm [shape: f32[4,256], index: 8, kind: output, shape index: {0}]   ;;  %s3208_s9 = inlined_call_operand.hbm [shape: f32[4,10], index: 9, kind: output, shape index: {1}]  }
   0x1   :  { %16 = vsyncpa [#allocation5], 0 }
   0x2   :  { %17 = vsyncpa [#allocation9], 0  ;;  %s24_s11 = sshll.u32 %s3199_s0, 4  ;;  %s25_s11 = int_to_ptr.vmem [resolvable:$true] %s24_s11 }
   0x3   :  { %s2511_s12 = scalar_lea.vmem %s25_s11, 128  ;;  %p2516_p1 = scmp.lt.s32.totalorder %s25_s11, %s25_s11 }
   0x4   :  { %p2512_p0 = scmp.ne.s32.totalorder %s25_s11, %s2511_s12  ;;  %p2517_p2 = scmp.lt.s32.totalorder %s2511_s12, %s2511_s12 }
   0x6   :  { %p2518_p3 = por %p2517_p2, %p2516_p1 }
   0x8   :  { %p2519_p4 = pnand %p2518_p3, %p2512_p0 }
   0xa   :  { %2522 = shalt.err (!%p2519_p4)
}
   0xb   :  { %s2569_s13 = smov [#allocation4]  }
   0xc   :  { %27 = dma.vmem_to_smem %s25_s11, 128, %s2569_s13, [#allocation6]  }
   0xd   :  { %2563 = dma.done.wait [#allocation6], 128  }
   0xe   :  { %2564 = vsyncadd [#allocation6], 4294967168 }
   0xf   :  { %45 = sfence }
  0x10   :  { %v2633_v0 = vld [vmem:[%s3203_s4 + $0x18] sm:$0xff]  ;;  %vm46_vm0 = vcmask 261120   ;;  %v2570_v1 = vmov 0.0   ;;  %v2639_v2 = vld [vmem:[%s3203_s4 + $0x10] sm:$0xff]  ;;  %vm2571_vm1 = vmmov 0   ;;  %s2651_s21 = sld [smem:[#allocation4]] }
  0x11   :  { %2232 = vmatprep.subr.mxu1 %v2570_v1  ;;  %2240 = vmatprep.mubr.msk.f32.mxu1 %vm2571_vm1, %v2570_v1  ;;  %v195_v3 = vld [vmem:[%s3201_s2 + $0x18] sm:$0xff]  ;;  %v194_v4 = vld [vmem:[%s3201_s2 + $0x10] sm:$0xff]  ;;  %47 = vst.msk [vmem:[#allocation2] sm:$0xff] %vm46_vm0, %v2570_v1  ;;  %48 = vst.msk [vmem:[#allocation2 + $0x8] sm:$0xff] %vm46_vm0, %v2570_v1  ;;  %s2668_s22 = sld [smem:[#allocation4 + $0x1]]  ;;  %vm58_vm2 = vcmask 253952  }
  0x12   :  { %49 = vst.msk [vmem:[#allocation2 + $0x10] sm:$0xff] %vm46_vm0, %v2570_v1  ;;  %50 = vst.msk [vmem:[#allocation2 + $0x18] sm:$0xff] %vm46_vm0, %v2570_v1  ;;  %2233 = vmatpush3.msra.mxu1 %v2633_v0  ;;  %2212 = vmatprep.subr.mxu0 %v195_v3  ;;  %v2674_v5 = vld [vmem:[%s3203_s4 + $0x8] sm:$0xff]  ;;  %s2049_s27 = sld [smem:[#allocation4 + $0x2]]  ;;  %v2686_v7 = vld [vmem:[%s3203_s4] sm:$0xff]  ;;  %s2572_s17 = smov 64  }
  0x13   :  { %51 = vst.msk [vmem:[#allocation2 + $0x20] sm:$0xff] %vm46_vm0, %v2570_v1  ;;  %52 = vst.msk [vmem:[#allocation2 + $0x28] sm:$0xff] %vm46_vm0, %v2570_v1  ;;  %2234 = vmatprep.subr.mxu1 %v2570_v1  ;;  %2213 = vmatpush3.msra.mxu0 %v195_v3  ;;  %v193_v6 = vld [vmem:[%s3201_s2 + $0x8] sm:$0xff]  ;;  %s2680_s28 = sld [smem:[#allocation4 + $0x3]]  ;;  %v192_v8 = vld [vmem:[%s3201_s2] sm:$0xff]  ;;  %vm332_vm3 = vcmask 785408  }
  0x14   :  { %53 = vst.msk [vmem:[#allocation2 + $0x30] sm:$0xff] %vm46_vm0, %v2570_v1  ;;  %54 = vst.msk [vmem:[#allocation2 + $0x38] sm:$0xff] %vm46_vm0, %v2570_v1  ;;  %2235 = vmatpush3.msra.mxu1 %v2639_v2  ;;  %2214 = vmatprep.subr.mxu0 %v194_v4  ;;  %s2691_s12 = sld [smem:[#allocation4 + $0x80]]  ;;  %v2767_v19 = vld [vmem:[%s3204_s5] ss:$0 sm:$0xff]  ;;  %vm456_vm4 = vcmask 257024  }
  0x15   :  { %2236 = vmatprep.subr.mxu1 %v2570_v1  ;;  %2215 = vmatpush3.msra.mxu0 %v194_v4  ;;  %s2694_s13 = sld [smem:[#allocation4 + $0x81]]  ;;  %v2774_v24 = vld [vmem:[%s3202_s3] ss:$0 sm:$0xff]  ;;  %s2573_s3 = smov 96   ;;  %vm658_vm5 = vcmask 519424   ;;  %vm867_vm6 = vcmask 781824  }
  0x16   :  { %2237 = vmatpush3.msra.mxu1 %v2674_v5  ;;  %2216 = vmatprep.subr.mxu0 %v193_v6  ;;  %s56_s0 = scalar_lea.vmem %s3200_s1, %s2651_s21  ;;  %s2701_s16 = sld [smem:[#allocation4 + $0x82]]  ;;  %vm1075_vm7 = vcmask 1044224  }
  0x17   :  { %2238 = vmatprep.subr.mxu1 %v2570_v1  ;;  %2217 = vmatpush3.msra.mxu0 %v193_v6  ;;  %v57_v9 = vld [vmem:[%s56_s0] sm:$0x1]  ;;  %s61_s18 = scalar_lea.vmem %s3200_s1, %s2668_s22  ;;  %s2708_s19 = sld [smem:[#allocation4 + $0x83]] }
  0x18   :  { %2239 = vmatpush3.msra.mxu1 %v2686_v7  ;;  %2218 = vmatprep.subr.mxu0 %v192_v8  ;;  %59 = vst.msk [vmem:[#allocation2] sm:$0x1] %vm58_vm2, %v57_v9  ;;  %v62_v10 = vld [vmem:[%s61_s18] sm:$0x1]  ;;  %s65_s23 = scalar_lea.vmem %s3200_s1, %s2049_s27  ;;  %s2055_s20 = sld [smem:[#allocation4 + $0x100]] }
  0x19   :  { %2241 = vmatmul.mubr.f32.vlgmr.msra.gmra.mxu1 %v2570_v1  ;;  %2219 = vmatpush3.msra.mxu0 %v192_v8  ;;  %63 = vst.msk [vmem:[#allocation2 + $0x1] sm:$0x1] %vm58_vm2, %v62_v10  ;;  %v66_v11 = vld [vmem:[%s65_s23] sm:$0x1]  ;;  %s69_s22 = scalar_lea.vmem %s3200_s1, %s2680_s28  ;;  %s2056_s21 = sld [smem:[#allocation4 + $0x101]] }
  0x1a   :  { %2243 = vmatprep.subr.mxu1 %v2570_v1  ;;  %2251 = vmatprep.mubr.msk.f32.mxu1 %vm2571_vm1, %v2570_v1  ;;  %67 = vst.msk [vmem:[#allocation2 + $0x2] sm:$0x1] %vm58_vm2, %v66_v11  ;;  %v70_v12 = vld [vmem:[%s69_s22] sm:$0x1]  ;;  %s73_s27 = scalar_lea.vmem %s3200_s1, %s2691_s12  ;;  %s2057_s23 = sld [smem:[#allocation4 + $0x102]] }
  0x1b   :  { %2244 = vmatpush3.msra.mxu1 %v2633_v0  ;;  %2254 = vmatprep.subr.mxu0 %v2570_v1  ;;  %71 = vst.msk [vmem:[#allocation2 + $0x3] sm:$0x1] %vm58_vm2, %v70_v12  ;;  %v74_v13 = vld [vmem:[%s73_s27] sm:$0x1]  ;;  %s77_s10 = scalar_lea.vmem %s3200_s1, %s2694_s13  ;;  %s2058_s24 = sld [smem:[#allocation4 + $0x103]] }
  0x1c   :  { %2245 = vmatprep.subr.mxu1 %v2570_v1  ;;  %75 = vst.msk [vmem:[#allocation2 + $0x8] sm:$0x1] %vm58_vm2, %v74_v13  ;;  %v78_v14 = vld [vmem:[%s77_s10] sm:$0x1]  ;;  %s81_s12 = scalar_lea.vmem %s3200_s1, %s2701_s16  ;;  %s2059_s25 = sld [smem:[#allocation4 + $0x180]] }
  0x1d   :  { %2246 = vmatpush3.msra.mxu1 %v2639_v2  ;;  %79 = vst.msk [vmem:[#allocation2 + $0x9] sm:$0x1] %vm58_vm2, %v78_v14  ;;  %v82_v15 = vld [vmem:[%s81_s12] sm:$0x1]  ;;  %s85_s2 = scalar_lea.vmem %s3200_s1, %s2708_s19  ;;  %s2060_s22 = sld [smem:[#allocation4 + $0x181]] }
  0x1e   :  { %2247 = vmatprep.subr.mxu1 %v2570_v1  ;;  %83 = vst.msk [vmem:[#allocation2 + $0xa] sm:$0x1] %vm58_vm2, %v82_v15  ;;  %v86_v16 = vld [vmem:[%s85_s2] sm:$0x1]  ;;  %s89_s27 = scalar_lea.vmem %s3200_s1, %s2055_s20  ;;  %s2061_s28 = sld [smem:[#allocation4 + $0x182]] }
  0x1f   :  { %2248 = vmatpush3.msra.mxu1 %v2674_v5  ;;  %87 = vst.msk [vmem:[#allocation2 + $0xb] sm:$0x1] %vm58_vm2, %v86_v16  ;;  %v90_v58 = vld [vmem:[%s89_s27] sm:$0x1]  ;;  %s93_s11 = scalar_lea.vmem %s3200_s1, %s2056_s21  ;;  %s2062_s14 = sld [smem:[#allocation4 + $0x183]] }
  0x20   :  { %2249 = vmatprep.subr.mxu1 %v2570_v1  ;;  %91 = vst.msk [vmem:[#allocation2 + $0x10] sm:$0x1] %vm58_vm2, %v90_v58  ;;  %v94_v60 = vld [vmem:[%s93_s11] sm:$0x1]  ;;  %s97_s0 = scalar_lea.vmem %s3200_s1, %s2057_s23  ;;  %s2063_s2 = sld [smem:[#allocation4 + $0x200]] }
  0x21   :  { %2250 = vmatpush3.msra.mxu1 %v2686_v7  ;;  %95 = vst.msk [vmem:[#allocation2 + $0x11] sm:$0x1] %vm58_vm2, %v94_v60  ;;  %v98_v61 = vld [vmem:[%s97_s0] sm:$0x1]  ;;  %s101_s18 = scalar_lea.vmem %s3200_s1, %s2058_s24  ;;  %s2064_s19 = sld [smem:[#allocation4 + $0x201]] }
  0x22   :  { %2265 = vmatprep.subr.mxu1 %v2570_v1  ;;  %v184_v17 = vld [vmem:[#allocation2] sm:$0xff]  ;;  %99 = vst.msk [vmem:[#allocation2 + $0x12] sm:$0x1] %vm58_vm2, %v98_v61  ;;  %s105_s26 = scalar_lea.vmem %s3200_s1, %s2059_s25  ;;  %s2065_s29 = sld [smem:[#allocation4 + $0x202]] }
  0x23   :  { %2220 = vmatprep.mubr.msk.f32.mxu0 %vm46_vm0, %v184_v17  ;;  %v102_v62 = vld [vmem:[%s101_s18] sm:$0x1]  ;;  %s109_s30 = scalar_lea.vmem %s3200_s1, %s2060_s22  ;;  %s2066_s10 = sld [smem:[#allocation4 + $0x203]] }
  0x24   :  { %103 = vst.msk [vmem:[#allocation2 + $0x13] sm:$0x1] %vm58_vm2, %v102_v62  ;;  %v106_v63 = vld [vmem:[%s105_s26] sm:$0x1]  ;;  %s113_s12 = scalar_lea.vmem %s3200_s1, %s2061_s28  ;;  %s2067_s15 = sld [smem:[#allocation4 + $0x280]] }
  0x25   :  { %107 = vst.msk [vmem:[#allocation2 + $0x18] sm:$0x1] %vm58_vm2, %v106_v63  ;;  %v110_v3 = vld [vmem:[%s109_s30] sm:$0x1]  ;;  %s117_s13 = scalar_lea.vmem %s3200_s1, %s2062_s14  ;;  %s2068_s16 = sld [smem:[#allocation4 + $0x281]] }
  0x26   :  { %v185_v18 = vld [vmem:[#allocation2 + $0x8] sm:$0xff]  ;;  %111 = vst.msk [vmem:[#allocation2 + $0x19] sm:$0x1] %vm58_vm2, %v110_v3  ;;  %v114_v4 = vld [vmem:[%s113_s12] sm:$0x1]  ;;  %s121_s20 = scalar_lea.vmem %s3200_s1, %s2063_s2  ;;  %s2069_s21 = sld [smem:[#allocation4 + $0x282]] }
  0x27   :  { %2221 = vmatmul.mubr.msk.f32.vlgmr.msra.gmra.mxu0 %vm46_vm0, %v185_v18  ;;  %115 = vst.msk [vmem:[#allocation2 + $0x1a] sm:$0x1] %vm58_vm2, %v114_v4  ;;  %v118_v6 = vld [vmem:[%s117_s13] sm:$0x1]  ;;  %s125_s23 = scalar_lea.vmem %s3200_s1, %s2064_s19  ;;  %s2847_s27 = sld [smem:[#allocation4 + $0x283]] }
  0x28   :  { %2255 = vmatpush3.msra.mxu0 %v2633_v0  ;;  %119 = vst.msk [vmem:[#allocation2 + $0x1b] sm:$0x1] %vm58_vm2, %v118_v6  ;;  %v122_v8 = vld [vmem:[%s121_s20] sm:$0x1]  ;;  %s129_s24 = scalar_lea.vmem %s3200_s1, %s2065_s29  ;;  %s2853_s11 = sld [smem:[#allocation4 + $0x300]] }
  0x29   :  { %2256 = vmatprep.subr.mxu0 %v2570_v1  ;;  %123 = vst.msk [vmem:[#allocation2 + $0x20] sm:$0x1] %vm58_vm2, %v122_v8  ;;  %v126_v9 = vld [vmem:[%s125_s23] sm:$0x1]  ;;  %s133_s25 = scalar_lea.vmem %s3200_s1, %s2066_s10  ;;  %s2859_s0 = sld [smem:[#allocation4 + $0x301]] }
  0x2a   :  { %2257 = vmatpush3.msra.mxu0 %v2639_v2  ;;  %127 = vst.msk [vmem:[#allocation2 + $0x21] sm:$0x1] %vm58_vm2, %v126_v9  ;;  %v130_v10 = vld [vmem:[%s129_s24] sm:$0x1]  ;;  %s137_s29 = scalar_lea.vmem %s3200_s1, %s2067_s15  ;;  %s2073_s22 = sld [smem:[#allocation4 + $0x302]] }
  0x2b   :  { %2258 = vmatprep.subr.mxu0 %v2570_v1  ;;  %v186_v11 = vld [vmem:[#allocation2 + $0x10] sm:$0xff]  ;;  %131 = vst.msk [vmem:[#allocation2 + $0x22] sm:$0x1] %vm58_vm2, %v130_v10  ;;  %v134_v12 = vld [vmem:[%s133_s25] sm:$0x1]  ;;  %s141_s20 = scalar_lea.vmem %s3200_s1, %s2068_s16  ;;  %s2074_s28 = sld [smem:[#allocation4 + $0x303]] }
  0x2c   :  { %2259 = vmatpush3.msra.mxu0 %v2674_v5  ;;  %2223 = vmatprep.mubr.msk.f32.mxu0 %vm46_vm0, %v186_v11  ;;  %135 = vst.msk [vmem:[#allocation2 + $0x23] sm:$0x1] %vm58_vm2, %v134_v12  ;;  %v138_v13 = vld [vmem:[%s137_s29] sm:$0x1]  ;;  %s145_s15 = scalar_lea.vmem %s3200_s1, %s2069_s21  ;;  %s2075_s14 = sld [smem:[#allocation4 + $0x380]] }
  0x2d   :  { %2260 = vmatprep.subr.mxu0 %v2570_v1  ;;  %139 = vst.msk [vmem:[#allocation2 + $0x28] sm:$0x1] %vm58_vm2, %v138_v13  ;;  %v142_v14 = vld [vmem:[%s141_s20] sm:$0x1]  ;;  %s149_s2 = scalar_lea.vmem %s3200_s1, %s2847_s27  ;;  %s2076_s12 = sld [smem:[#allocation4 + $0x381]] }
  0x2e   :  { %2261 = vmatpush3.msra.mxu0 %v2686_v7  ;;  %143 = vst.msk [vmem:[#allocation2 + $0x29] sm:$0x1] %vm58_vm2, %v142_v14  ;;  %v146_v15 = vld [vmem:[%s145_s15] sm:$0x1]  ;;  %s153_s19 = scalar_lea.vmem %s3200_s1, %s2853_s11  ;;  %s2077_s13 = sld [smem:[#allocation4 + $0x382]] }
  0x2f   :  { %2276 = vmatprep.subr.mxu0 %v2570_v1  ;;  %v187_v16 = vld [vmem:[#allocation2 + $0x18] sm:$0xff]  ;;  %147 = vst.msk [vmem:[#allocation2 + $0x2a] sm:$0x1] %vm58_vm2, %v146_v15  ;;  %v150_v17 = vld [vmem:[%s149_s2] sm:$0x1]  ;;  %s157_s18 = scalar_lea.vmem %s3200_s1, %s2859_s0  ;;  %s2078_s27 = sld [smem:[#allocation4 + $0x383]] }
  0x30   :  { %2224 = vmatmul.mubr.msk.f32.gmra.mxu0 %vm46_vm0, %v187_v16  ;;  %151 = vst.msk [vmem:[#allocation2 + $0x2b] sm:$0x1] %vm58_vm2, %v150_v17  ;;  %v154_v18 = vld [vmem:[%s153_s19] sm:$0x1]  ;;  %s161_s26 = scalar_lea.vmem %s3200_s1, %s2073_s22 }
  0x31   :  { %155 = vst.msk [vmem:[#allocation2 + $0x30] sm:$0x1] %vm58_vm2, %v154_v18  ;;  %s165_s15 = scalar_lea.vmem %s3200_s1, %s2074_s28 }
  0x32   :  { %s169_s24 = scalar_lea.vmem %s3200_s1, %s2075_s14 }
  0x33   :  { %s173_s16 = scalar_lea.vmem %s3200_s1, %s2076_s12 }
  0x34   :  { %s177_s19 = scalar_lea.vmem %s3200_s1, %s2077_s13 }
  0x35   :  { %s181_s29 = scalar_lea.vmem %s3200_s1, %s2078_s27 }
  0xd9   :  { %v422_v20 = vpop.f32.mrf.mxu1 }
  0xda   :  { %v423_v21 = vadd.f32 %v2767_v19, %v422_v20  ;;  %v158_v20 = vld [vmem:[%s157_s18] sm:$0x1] }
  0xdb   :  { %v2242_v22 = vpop.f32.mrf.mxu1  ;;  %159 = vst.msk [vmem:[#allocation2 + $0x31] sm:$0x1] %vm58_vm2, %v158_v20 }
  0xdc   :  { %434 = vrot.lane.b32.xlu0 %v423_v21, %s2572_s17  ;;  %v188_v22 = vld [vmem:[#allocation2 + $0x20] sm:$0xff] }
  0xdd   :  { %2226 = vmatprep.mubr.msk.f32.mxu0 %vm46_vm0, %v188_v22 }
  0xe7   :  { %v2222_v23 = vpop.f32.mrf.mxu0 }
  0xe8   :  { %v299_v25 = vadd.f32 %v2222_v23, %v2774_v24  ;;  %v166_v23 = vld [vmem:[%s165_s15] sm:$0x1] }
  0xe9   :  { %v293_v26 = vpop.f32.mrf.mxu0  ;;  %167 = vst.msk [vmem:[#allocation2 + $0x33] sm:$0x1] %vm58_vm2, %v166_v23 }
  0xea   :  { %334 = vst.msk [vmem:[#allocation3 + $0x8] sm:$0xff] %vm332_vm3, %v299_v25  ;;  %v294_v27 = vadd.f32 %v2774_v24, %v293_v26  ;;  %v170_v25 = vld [vmem:[%s169_s24] sm:$0x1] }
  0xeb   :  { %171 = vst.msk [vmem:[#allocation2 + $0x38] sm:$0x1] %vm58_vm2, %v170_v25  ;;  %v174_v26 = vld [vmem:[%s173_s16] sm:$0x1]  ;;  %s2574_s16 = smov 32  }
  0xec   :  { %333 = vst.msk [vmem:[#allocation3] sm:$0xff] %vm332_vm3, %v294_v27  ;;  %v178_v27 = vld [vmem:[%s177_s19] sm:$0x1] }
  0xed   :  { %175 = vst.msk [vmem:[#allocation2 + $0x39] sm:$0x1] %vm58_vm2, %v174_v26  ;;  %179 = vst.msk [vmem:[#allocation2 + $0x3a] sm:$0x1] %vm58_vm2, %v178_v27 }
  0xf1   :  { %v2800_v48 = vld [vmem:[#allocation3 + $0x8] sm:$0xff] }
  0xf3   :  { %v346_v28 = vld [vmem:[#allocation3] sm:$0xff] }
  0xf4   :  { %v426_v29 = vadd.f32 %v423_v21, %v346_v28  ;;  %v162_v21 = vld [vmem:[%s161_s26] sm:$0x1] }
  0xf5   :  { %163 = vst.msk [vmem:[#allocation2 + $0x32] sm:$0x1] %vm58_vm2, %v162_v21 }
  0xf6   :  { %v2089_v30 = vmul.f32 -1.442695, %v426_v29  ;;  %v182_v29 = vld [vmem:[%s181_s29] sm:$0x1] }
  0xf7   :  { %183 = vst.msk [vmem:[#allocation2 + $0x3b] sm:$0x1] %vm58_vm2, %v182_v29 }
  0xf8   :  { %2416 = vpow2.f32 %v2089_v30 }
  0xfc   :  { %v190_v30 = vld [vmem:[#allocation2 + $0x30] sm:$0xff] }
 0x105   :  { %v2417_v31 = vpop.eup %2416 }
 0x106   :  { %v430_v32 = vadd.f32 1.0, %v2417_v31  ;;  %v191_v31 = vld [vmem:[#allocation2 + $0x38] sm:$0xff] }
 0x108   :  { %2418 = vrcp.f32 %v430_v32 }
 0x115   :  { %v2419_v33 = vpop.eup %2418 }
 0x116   :  { %v444_v39 = vsub.f32 1.0, %v2419_v33  ;;  %v450_v41 = vmul.f32 0.0, %v2419_v33 }
 0x14e   :  { %v435_v34 = vpop.permute.xlu0 %434 }
 0x14f   :  { %v437_v35 = vmul.f32 %v2419_v33, %v435_v34 }
 0x151   :  { %439 = vrot.lane.b32.xlu0 %v437_v35, %s2572_s17 }
 0x1c3   :  { %v440_v36 = vpop.permute.xlu0 %439 }
 0x1c4   :  { %v442_v37 = vadd.f32 %v440_v36, %v346_v28  ;;  %v189_v28 = vld [vmem:[#allocation2 + $0x28] sm:$0xff] }
 0x1c5   :  { %2227 = vmatmul.mubr.msk.f32.gmra.mxu0 %vm46_vm0, %v189_v28 }
 0x1c6   :  { %2420 = vtanh.f32 %v442_v37  ;;  %2229 = vmatprep.mubr.msk.f32.mxu0 %vm46_vm0, %v190_v30  ;;  %v2225_v37 = vpop.f32.mrf.mxu0 }
 0x1c9   :  { %2230 = vmatmul.mubr.msk.f32.gmra.mxu0 %vm46_vm0, %v191_v31 }
 0x1ca   :  { %2262 = vmatprep.mubr.msk.f32.mxu0 %vm2571_vm1, %v2570_v1 }
 0x1d3   :  { %v2421_v38 = vpop.eup %2420 }
 0x1d4   :  { %446 = vrot.lane.b32.xlu1 %v2421_v38, %s2573_s3  ;;  %v309_v38 = vadd.f32 %v2225_v37, %v2774_v24 }
 0x1d6   :  { %336 = vst.msk [vmem:[#allocation3 + $0x18] sm:$0xff] %vm332_vm3, %v309_v38 }
 0x246   :  { %v447_v40 = vpop.permute.xlu1 %446 }
 0x247   :  { %v449_v42 = vmul.f32 %v447_v40, %v444_v39  ;;  %v303_v39 = vpop.f32.mrf.mxu0 }
 0x248   :  { %v304_v40 = vadd.f32 %v2774_v24, %v303_v39 }
 0x249   :  { %v2782_v43 = vadd.f32 %v450_v41, %v449_v42 }
 0x24a   :  { %335 = vst.msk [vmem:[#allocation3 + $0x10] sm:$0xff] %vm332_vm3, %v304_v40 }
 0x24b   :  { %453 = vrot.lane.b32.xlu1 %v2782_v43, %s2573_s3 }
 0x251   :  { %v660_v12 = vld [vmem:[#allocation3 + $0x10] sm:$0xff] }
 0x285   :  { %v2228_v41 = vpop.f32.mrf.mxu0 }
 0x286   :  { %v319_v42 = vadd.f32 %v2228_v41, %v2774_v24 }
 0x288   :  { %338 = vst.msk [vmem:[#allocation3 + $0x28] sm:$0xff] %vm332_vm3, %v319_v42 }
 0x2bd   :  { %v454_v44 = vpop.permute.xlu1 %453 }
 0x2be   :  { %457 = vst.msk [vmem:[#allocation7] sm:$0xf] %vm456_vm4, %v454_v44  ;;  %2252 = vmatmul.mubr.msk.f32.vlgmr.msra.gmra.mxu1 %vm46_vm0, %v454_v44  ;;  %v313_v44 = vpop.f32.mrf.mxu0 }
 0x2bf   :  { %2266 = vmatpush3.msra.mxu1 %v2633_v0  ;;  %2273 = vmatprep.mubr.msk.f32.mxu1 %vm2571_vm1, %v2570_v1 }
 0x2c0   :  { %2267 = vmatprep.subr.mxu1 %v2570_v1 }
 0x2c1   :  { %2268 = vmatpush3.msra.mxu1 %v2639_v2 }
 0x2c2   :  { %2269 = vmatprep.subr.mxu1 %v2570_v1 }
 0x2c3   :  { %2270 = vmatpush3.msra.mxu1 %v2674_v5 }
 0x2c4   :  { %2271 = vmatprep.subr.mxu1 %v2570_v1 }
 0x2c5   :  { %2272 = vmatpush3.msra.mxu1 %v2686_v7 }
 0x2c6   :  { %2287 = vmatprep.subr.mxu1 %v2570_v1 }
 0x37e   :  { %v527_v45 = vpop.f32.mrf.mxu1 }
 0x37f   :  { %v528_v46 = vadd.f32 %v2767_v19, %v527_v45  ;;  %v2231_v45 = vpop.f32.mrf.mxu0 }
 0x380   :  { %v2253_v47 = vpop.f32.mrf.mxu1 }
 0x381   :  { %539 = vrot.lane.b32.xlu0 %v528_v46, %s2572_s17  ;;  %v531_v49 = vadd.f32 %v528_v46, %v2800_v48  ;;  %v329_v46 = vadd.f32 %v2231_v45, %v2774_v24  ;;  %v323_v47 = vpop.f32.mrf.mxu0 }
 0x383   :  { %v2091_v50 = vmul.f32 -1.442695, %v531_v49  ;;  %340 = vst.msk [vmem:[#allocation3 + $0x38] sm:$0xff] %vm332_vm3, %v329_v46  ;;  %v324_v49 = vadd.f32 %v2774_v24, %v323_v47 }
 0x385   :  { %2422 = vpow2.f32 %v2091_v50  ;;  %339 = vst.msk [vmem:[#allocation3 + $0x30] sm:$0xff] %vm332_vm3, %v324_v49 }
 0x392   :  { %v2423_v51 = vpop.eup %2422 }
 0x393   :  { %v535_v52 = vadd.f32 1.0, %v2423_v51 }
 0x395   :  { %2424 = vrcp.f32 %v535_v52 }
 0x3a2   :  { %v2803_v53 = vpop.eup %2424 }
 0x3a3   :  { %v549_v32 = vsub.f32 1.0, %v2803_v53  ;;  %v555_v34 = vmul.f32 %v2803_v53, %v2782_v43  ;;  %v314_v43 = vadd.f32 %v2774_v24, %v313_v44 }
 0x3a5   :  { %337 = vst.msk [vmem:[#allocation3 + $0x20] sm:$0xff] %vm332_vm3, %v314_v43 }
 0x3f3   :  { %v540_v54 = vpop.permute.xlu0 %539 }
 0x3f4   :  { %v542_v55 = vmul.f32 %v2803_v53, %v540_v54 }
 0x3f6   :  { %544 = vrot.lane.b32.xlu1 %v542_v55, %s2572_s17 }
 0x468   :  { %v545_v56 = vpop.permute.xlu1 %544 }
 0x469   :  { %v547_v57 = vadd.f32 %v545_v56, %v2800_v48 }
 0x46b   :  { %2426 = vtanh.f32 %v547_v57 }
 0x478   :  { %v2427_v59 = vpop.eup %2426 }
 0x479   :  { %551 = vrot.lane.b32.xlu0 %v2427_v59, %s2573_s3 }
 0x4eb   :  { %v552_v33 = vpop.permute.xlu0 %551 }
 0x4ec   :  { %v554_v35 = vmul.f32 %v552_v33, %v549_v32 }
 0x4ee   :  { %v556_v36 = vadd.f32 %v555_v34, %v554_v35 }
 0x4f0   :  { %558 = vrot.lane.b32.xlu1 %v556_v36, %s2573_s3 }
 0x562   :  { %v559_v50 = vpop.permute.xlu1 %558 }
 0x563   :  { %2263 = vmatmul.mubr.msk.f32.vlgmr.msra.gmra.mxu0 %vm46_vm0, %v559_v50 }
 0x564   :  { %2277 = vmatpush3.msra.mxu0 %v2633_v0  ;;  %2284 = vmatprep.mubr.msk.f32.mxu0 %vm2571_vm1, %v2570_v1 }
 0x565   :  { %2278 = vmatprep.subr.mxu0 %v2570_v1 }
 0x566   :  { %2279 = vmatpush3.msra.mxu0 %v2639_v2 }
 0x567   :  { %2280 = vmatprep.subr.mxu0 %v2570_v1 }
 0x568   :  { %2281 = vmatpush3.msra.mxu0 %v2674_v5 }
 0x569   :  { %2282 = vmatprep.subr.mxu0 %v2570_v1 }
 0x56a   :  { %2283 = vmatpush3.msra.mxu0 %v2686_v7 }
 0x56b   :  { %2298 = vmatprep.subr.mxu0 %v2570_v1 }
 0x623   :  { %v628_v24 = vpop.f32.mrf.mxu0 }
 0x624   :  { %v629_v51 = vadd.f32 %v2767_v19, %v628_v24 }
 0x625   :  { %v2264_v52 = vpop.f32.mrf.mxu0 }
 0x626   :  { %640 = vrot.lane.b32.xlu0 %v629_v51, %s2572_s17  ;;  %v632_v53 = vadd.f32 %v629_v51, %v2800_v48 }
 0x628   :  { %v2093_v54 = vmul.f32 -1.442695, %v632_v53  ;;  %v869_v53 = vld [vmem:[#allocation3 + $0x18] sm:$0xff] }
 0x62a   :  { %2428 = vpow2.f32 %v2093_v54 }
 0x637   :  { %v2429_v55 = vpop.eup %2428 }
 0x638   :  { %v636_v56 = vadd.f32 1.0, %v2429_v55 }
 0x63a   :  { %2430 = vrcp.f32 %v636_v56 }
 0x647   :  { %v2431_v57 = vpop.eup %2430 }
 0x648   :  { %v650_v63 = vsub.f32 1.0, %v2431_v57  ;;  %v656_v4 = vmul.f32 %v2431_v57, %v556_v36 }
 0x698   :  { %v641_v58 = vpop.permute.xlu0 %640 }
 0x699   :  { %v643_v59 = vmul.f32 %v2431_v57, %v641_v58 }
 0x69b   :  { %645 = vrot.lane.b32.xlu1 %v643_v59, %s2572_s17 }
 0x70d   :  { %v646_v60 = vpop.permute.xlu1 %645 }
 0x70e   :  { %v648_v61 = vadd.f32 %v646_v60, %v2800_v48 }
 0x710   :  { %2432 = vtanh.f32 %v648_v61 }
 0x71d   :  { %v2433_v62 = vpop.eup %2432 }
 0x71e   :  { %652 = vrot.lane.b32.xlu0 %v2433_v62, %s2573_s3 }
 0x790   :  { %v653_v3 = vpop.permute.xlu0 %652 }
 0x791   :  { %v655_v6 = vmul.f32 %v653_v3, %v650_v63 }
 0x793   :  { %v657_v8 = vadd.f32 %v656_v4, %v655_v6 }
 0x795   :  { %662 = vrot.lane.b32.xlu1 %v657_v8, %s2573_s3  ;;  %659 = vst.msk [vmem:[#allocation7] sm:$0xf] %vm658_vm5, %v657_v8 }
 0x807   :  { %v663_v9 = vpop.permute.xlu1 %662 }
 0x808   :  { %2274 = vmatmul.mubr.msk.f32.vlgmr.msra.gmra.mxu1 %vm46_vm0, %v663_v9 }
 0x809   :  { %2288 = vmatpush3.msra.mxu1 %v2633_v0  ;;  %2295 = vmatprep.mubr.msk.f32.mxu1 %vm2571_vm1, %v2570_v1 }
 0x80a   :  { %2289 = vmatprep.subr.mxu1 %v2570_v1 }
 0x80b   :  { %2290 = vmatpush3.msra.mxu1 %v2639_v2 }
 0x80c   :  { %2291 = vmatprep.subr.mxu1 %v2570_v1 }
 0x80d   :  { %2292 = vmatpush3.msra.mxu1 %v2674_v5 }
 0x80e   :  { %2293 = vmatprep.subr.mxu1 %v2570_v1 }
 0x80f   :  { %2294 = vmatpush3.msra.mxu1 %v2686_v7 }
 0x810   :  { %2309 = vmatprep.subr.mxu1 %v2570_v1 }
 0x8c8   :  { %v732_v48 = vpop.f32.mrf.mxu1 }
 0x8c9   :  { %v733_v10 = vadd.f32 %v2767_v19, %v732_v48 }
 0x8ca   :  { %v2275_v11 = vpop.f32.mrf.mxu1 }
 0x8cb   :  { %744 = vrot.lane.b32.xlu0 %v733_v10, %s2572_s17  ;;  %v736_v13 = vadd.f32 %v733_v10, %v660_v12 }
 0x8cd   :  { %v2095_v14 = vmul.f32 -1.442695, %v736_v13 }
 0x8cf   :  { %2434 = vpow2.f32 %v2095_v14 }
 0x8dc   :  { %v2435_v15 = vpop.eup %2434 }
 0x8dd   :  { %v740_v16 = vadd.f32 1.0, %v2435_v15 }
 0x8df   :  { %2436 = vrcp.f32 %v740_v16 }
 0x8ec   :  { %v2437_v17 = vpop.eup %2436 }
 0x8ed   :  { %v754_v25 = vsub.f32 1.0, %v2437_v17  ;;  %v760_v27 = vmul.f32 %v2437_v17, %v657_v8 }
 0x93d   :  { %v745_v18 = vpop.permute.xlu0 %744 }
 0x93e   :  { %v747_v20 = vmul.f32 %v2437_v17, %v745_v18 }
 0x940   :  { %749 = vrot.lane.b32.xlu1 %v747_v20, %s2572_s17 }
 0x9b2   :  { %v750_v21 = vpop.permute.xlu1 %749 }
 0x9b3   :  { %v752_v22 = vadd.f32 %v750_v21, %v660_v12 }
 0x9b5   :  { %2438 = vtanh.f32 %v752_v22 }
 0x9c2   :  { %v2439_v23 = vpop.eup %2438 }
 0x9c3   :  { %756 = vrot.lane.b32.xlu0 %v2439_v23, %s2573_s3 }
 0xa35   :  { %v757_v26 = vpop.permute.xlu0 %756 }
 0xa36   :  { %v759_v28 = vmul.f32 %v757_v26, %v754_v25 }
 0xa38   :  { %v761_v29 = vadd.f32 %v760_v27, %v759_v28 }
 0xa3a   :  { %763 = vrot.lane.b32.xlu1 %v761_v29, %s2573_s3 }
 0xaac   :  { %v764_v30 = vpop.permute.xlu1 %763 }
 0xaad   :  { %2285 = vmatmul.mubr.msk.f32.vlgmr.msra.gmra.mxu0 %vm46_vm0, %v764_v30 }
 0xaae   :  { %2299 = vmatpush3.msra.mxu0 %v2633_v0  ;;  %2306 = vmatprep.mubr.msk.f32.mxu0 %vm2571_vm1, %v2570_v1 }
 0xaaf   :  { %2300 = vmatprep.subr.mxu0 %v2570_v1 }
 0xab0   :  { %2301 = vmatpush3.msra.mxu0 %v2639_v2 }
 0xab1   :  { %2302 = vmatprep.subr.mxu0 %v2570_v1 }
 0xab2   :  { %2303 = vmatpush3.msra.mxu0 %v2674_v5 }
 0xab3   :  { %2304 = vmatprep.subr.mxu0 %v2570_v1 }
 0xab4   :  { %2305 = vmatpush3.msra.mxu0 %v2686_v7 }
 0xab5   :  { %2320 = vmatprep.subr.mxu0 %v2570_v1 }
 0xb6d   :  { %v833_v31 = vpop.f32.mrf.mxu0 }
 0xb6e   :  { %v834_v32 = vadd.f32 %v2767_v19, %v833_v31 }
 0xb6f   :  { %v2286_v33 = vpop.f32.mrf.mxu0 }
 0xb70   :  { %845 = vrot.lane.b32.xlu0 %v834_v32, %s2572_s17  ;;  %v837_v34 = vadd.f32 %v834_v32, %v660_v12  ;;  %v1077_v33 = vld [vmem:[#allocation3 + $0x20] sm:$0xff] }
 0xb72   :  { %v2097_v35 = vmul.f32 -1.442695, %v837_v34 }
 0xb74   :  { %2440 = vpow2.f32 %v2097_v35 }
 0xb81   :  { %v2441_v36 = vpop.eup %2440 }
 0xb82   :  { %v841_v37 = vadd.f32 1.0, %v2441_v36 }
 0xb84   :  { %2442 = vrcp.f32 %v841_v37 }
 0xb91   :  { %v2443_v38 = vpop.eup %2442 }
 0xb92   :  { %v855_v43 = vsub.f32 1.0, %v2443_v38  ;;  %v861_v46 = vmul.f32 %v2443_v38, %v761_v29 }
 0xbe2   :  { %v846_v39 = vpop.permute.xlu0 %845 }
 0xbe3   :  { %v848_v40 = vmul.f32 %v2443_v38, %v846_v39 }
 0xbe5   :  { %850 = vrot.lane.b32.xlu1 %v848_v40, %s2572_s17 }
 0xc57   :  { %v851_v41 = vpop.permute.xlu1 %850 }
 0xc58   :  { %v853_v42 = vadd.f32 %v851_v41, %v660_v12 }
 0xc5a   :  { %2444 = vtanh.f32 %v853_v42 }
 0xc67   :  { %v2445_v44 = vpop.eup %2444 }
 0xc68   :  { %857 = vrot.lane.b32.xlu0 %v2445_v44, %s2573_s3 }
 0xcda   :  { %v858_v45 = vpop.permute.xlu0 %857 }
 0xcdb   :  { %v860_v47 = vmul.f32 %v858_v45, %v855_v43 }
 0xcdd   :  { %v2988_v49 = vadd.f32 %v861_v46, %v860_v47 }
 0xcdf   :  { %870 = vrot.lane.b32.xlu1 %v2988_v49, %s2573_s3 }
 0xd51   :  { %v871_v50 = vpop.permute.xlu1 %870 }
 0xd52   :  { %2296 = vmatmul.mubr.msk.f32.vlgmr.msra.gmra.mxu1 %vm46_vm0, %v871_v50 }
 0xd53   :  { %2310 = vmatpush3.msra.mxu1 %v2633_v0  ;;  %2317 = vmatprep.mubr.msk.f32.mxu1 %vm2571_vm1, %v2570_v1 }
 0xd54   :  { %2311 = vmatprep.subr.mxu1 %v2570_v1 }
 0xd55   :  { %2312 = vmatpush3.msra.mxu1 %v2639_v2 }
 0xd56   :  { %2313 = vmatprep.subr.mxu1 %v2570_v1 }
 0xd57   :  { %2314 = vmatpush3.msra.mxu1 %v2674_v5 }
 0xd58   :  { %2315 = vmatprep.subr.mxu1 %v2570_v1 }
 0xd59   :  { %2316 = vmatpush3.msra.mxu1 %v2686_v7 }
 0xd5a   :  { %2331 = vmatprep.subr.mxu1 %v2570_v1 }
 0xe12   :  { %v940_v24 = vpop.f32.mrf.mxu1 }
 0xe13   :  { %v941_v51 = vadd.f32 %v2767_v19, %v940_v24  ;;  %v3049_v24 = vld [vmem:[%s3203_s4 + $0x18] sm:$0xff] }
 0xe14   :  { %v2297_v52 = vpop.f32.mrf.mxu1 }
 0xe15   :  { %952 = vrot.lane.b32.xlu0 %v941_v51, %s2572_s17  ;;  %v944_v54 = vadd.f32 %v941_v51, %v869_v53  ;;  %v3058_v51 = vld [vmem:[%s3203_s4 + $0x10] sm:$0xff] }
 0xe17   :  { %v2099_v55 = vmul.f32 -1.442695, %v944_v54 }
 0xe19   :  { %2446 = vpow2.f32 %v2099_v55 }
 0xe26   :  { %v2447_v56 = vpop.eup %2446 }
 0xe27   :  { %v948_v57 = vadd.f32 1.0, %v2447_v56 }
 0xe29   :  { %2448 = vrcp.f32 %v948_v57 }
 0xe36   :  { %v2449_v58 = vpop.eup %2448 }
 0xe37   :  { %v962_v3 = vsub.f32 1.0, %v2449_v58  ;;  %v968_v6 = vmul.f32 %v2449_v58, %v2988_v49 }
 0xe87   :  { %v953_v59 = vpop.permute.xlu0 %952 }
 0xe88   :  { %v955_v60 = vmul.f32 %v2449_v58, %v953_v59 }
 0xe8a   :  { %957 = vrot.lane.b32.xlu1 %v955_v60, %s2572_s17 }
 0xefc   :  { %v958_v61 = vpop.permute.xlu1 %957 }
 0xefd   :  { %v960_v62 = vadd.f32 %v958_v61, %v869_v53 }
 0xeff   :  { %2450 = vtanh.f32 %v960_v62 }
 0xf0c   :  { %v2451_v63 = vpop.eup %2450 }
 0xf0d   :  { %964 = vrot.lane.b32.xlu0 %v2451_v63, %s2573_s3 }
 0xf7f   :  { %v965_v4 = vpop.permute.xlu0 %964 }
 0xf80   :  { %v967_v8 = vmul.f32 %v965_v4, %v962_v3 }
 0xf82   :  { %v969_v9 = vadd.f32 %v968_v6, %v967_v8 }
 0xf84   :  { %971 = vrot.lane.b32.xlu1 %v969_v9, %s2573_s3 }
 0xff6   :  { %v972_v48 = vpop.permute.xlu1 %971 }
 0xff7   :  { %2307 = vmatmul.mubr.msk.f32.vlgmr.msra.gmra.mxu0 %vm46_vm0, %v972_v48  ;;  %v3082_v48 = vld [vmem:[%s3203_s4 + $0x8] sm:$0xff] }
 0xff8   :  { %2321 = vmatpush3.msra.mxu0 %v2633_v0  ;;  %2328 = vmatprep.mubr.msk.f32.mxu0 %vm2571_vm1, %v2570_v1 }
 0xff9   :  { %2322 = vmatprep.subr.mxu0 %v2570_v1 }
 0xffa   :  { %2323 = vmatpush3.msra.mxu0 %v2639_v2 }
 0xffb   :  { %2324 = vmatprep.subr.mxu0 %v2570_v1 }
 0xffc   :  { %2325 = vmatpush3.msra.mxu0 %v2674_v5 }
 0xffd   :  { %2326 = vmatprep.subr.mxu0 %v2570_v1 }
 0xffe   :  { %2327 = vmatpush3.msra.mxu0 %v2686_v7 }
 0xfff   :  { %2342 = vmatprep.subr.mxu0 %v2570_v1 }
0x10b7   :  { %v1041_v10 = vpop.f32.mrf.mxu0 }
0x10b8   :  { %v1042_v11 = vadd.f32 %v2767_v19, %v1041_v10  ;;  %v3089_v10 = vld [vmem:[%s3203_s4] sm:$0xff] }
0x10b9   :  { %v2308_v12 = vpop.f32.mrf.mxu0 }
0x10ba   :  { %1053 = vrot.lane.b32.xlu0 %v1042_v11, %s2572_s17  ;;  %v1045_v13 = vadd.f32 %v1042_v11, %v869_v53 }
0x10bc   :  { %v2101_v14 = vmul.f32 -1.442695, %v1045_v13 }
0x10be   :  { %2452 = vpow2.f32 %v2101_v14  ;;  %v1284_v14 = vld [vmem:[#allocation3 + $0x28] sm:$0xff] }
0x10cb   :  { %v2453_v15 = vpop.eup %2452 }
0x10cc   :  { %v1049_v16 = vadd.f32 1.0, %v2453_v15 }
0x10ce   :  { %2454 = vrcp.f32 %v1049_v16 }
0x10db   :  { %v2455_v17 = vpop.eup %2454 }
0x10dc   :  { %v1063_v25 = vsub.f32 1.0, %v2455_v17  ;;  %v1069_v27 = vmul.f32 %v2455_v17, %v969_v9 }
0x112c   :  { %v1054_v18 = vpop.permute.xlu0 %1053 }
0x112d   :  { %v1056_v20 = vmul.f32 %v2455_v17, %v1054_v18 }
0x112f   :  { %1058 = vrot.lane.b32.xlu1 %v1056_v20, %s2572_s17 }
0x11a1   :  { %v1059_v21 = vpop.permute.xlu1 %1058 }
0x11a2   :  { %v1061_v22 = vadd.f32 %v1059_v21, %v869_v53 }
0x11a4   :  { %2456 = vtanh.f32 %v1061_v22 }
0x11b1   :  { %v2457_v23 = vpop.eup %2456 }
0x11b2   :  { %1065 = vrot.lane.b32.xlu0 %v2457_v23, %s2573_s3 }
0x1224   :  { %v1066_v26 = vpop.permute.xlu0 %1065 }
0x1225   :  { %v1068_v28 = vmul.f32 %v1066_v26, %v1063_v25 }
0x1227   :  { %v3024_v29 = vadd.f32 %v1069_v27, %v1068_v28 }
0x1229   :  { %1078 = vrot.lane.b32.xlu1 %v3024_v29, %s2573_s3 }
0x129b   :  { %v1079_v30 = vpop.permute.xlu1 %1078 }
0x129c   :  { %2318 = vmatmul.mubr.msk.f32.vlgmr.msra.gmra.mxu1 %vm46_vm0, %v1079_v30 }
0x129d   :  { %2332 = vmatpush3.msra.mxu1 %v2633_v0  ;;  %2339 = vmatprep.mubr.msk.f32.mxu1 %vm2571_vm1, %v2570_v1 }
0x129e   :  { %2333 = vmatprep.subr.mxu1 %v2570_v1 }
0x129f   :  { %2334 = vmatpush3.msra.mxu1 %v2639_v2 }
0x12a0   :  { %2335 = vmatprep.subr.mxu1 %v2570_v1 }
0x12a1   :  { %2336 = vmatpush3.msra.mxu1 %v2674_v5 }
0x12a2   :  { %2337 = vmatprep.subr.mxu1 %v2570_v1 }
0x12a3   :  { %2338 = vmatpush3.msra.mxu1 %v2686_v7 }
0x12a4   :  { %2353 = vmatprep.subr.mxu1 %v2570_v1 }
0x135c   :  { %v1148_v31 = vpop.f32.mrf.mxu1 }
0x135d   :  { %v1149_v0 = vadd.f32 %v2767_v19, %v1148_v31 }
0x135e   :  { %v2319_v32 = vpop.f32.mrf.mxu1 }
0x135f   :  { %1160 = vrot.lane.b32.xlu0 %v1149_v0, %s2572_s17  ;;  %v1152_v34 = vadd.f32 %v1149_v0, %v1077_v33 }
0x1361   :  { %v2103_v35 = vmul.f32 -1.442695, %v1152_v34 }
0x1363   :  { %2458 = vpow2.f32 %v2103_v35 }
0x1370   :  { %v2459_v2 = vpop.eup %2458 }
0x1371   :  { %v1156_v36 = vadd.f32 1.0, %v2459_v2 }
0x1373   :  { %2460 = vrcp.f32 %v1156_v36 }
0x1380   :  { %v2461_v37 = vpop.eup %2460 }
0x1381   :  { %v1170_v44 = vsub.f32 1.0, %v2461_v37  ;;  %v1176_v45 = vmul.f32 %v2461_v37, %v3024_v29 }
0x13d1   :  { %v1161_v38 = vpop.permute.xlu0 %1160 }
0x13d2   :  { %v1163_v39 = vmul.f32 %v2461_v37, %v1161_v38 }
0x13d4   :  { %1165 = vrot.lane.b32.xlu1 %v1163_v39, %s2572_s17 }
0x1446   :  { %v1166_v40 = vpop.permute.xlu1 %1165 }
0x1447   :  { %v1168_v41 = vadd.f32 %v1166_v40, %v1077_v33 }
0x1449   :  { %2462 = vtanh.f32 %v1168_v41 }
0x1456   :  { %v2463_v42 = vpop.eup %2462 }
0x1457   :  { %1172 = vrot.lane.b32.xlu0 %v2463_v42, %s2573_s3 }
0x14c9   :  { %v1173_v43 = vpop.permute.xlu0 %1172 }
0x14ca   :  { %v1175_v46 = vmul.f32 %v1173_v43, %v1170_v44 }
0x14cc   :  { %v1177_v47 = vadd.f32 %v1176_v45, %v1175_v46 }
0x14ce   :  { %1179 = vrot.lane.b32.xlu1 %v1177_v47, %s2573_s3 }
0x1540   :  { %v1180_v50 = vpop.permute.xlu1 %1179 }
0x1541   :  { %2329 = vmatmul.mubr.msk.f32.vlgmr.msra.gmra.mxu0 %vm46_vm0, %v1180_v50 }
0x1542   :  { %2343 = vmatpush3.msra.mxu0 %v3049_v24  ;;  %2350 = vmatprep.mubr.msk.f32.mxu0 %vm2571_vm1, %v2570_v1 }
0x1543   :  { %2344 = vmatprep.subr.mxu0 %v2570_v1 }
0x1544   :  { %2345 = vmatpush3.msra.mxu0 %v3058_v51 }
0x1545   :  { %2346 = vmatprep.subr.mxu0 %v2570_v1 }
0x1546   :  { %2347 = vmatpush3.msra.mxu0 %v2674_v5 }
0x1547   :  { %2348 = vmatprep.subr.mxu0 %v2570_v1 }
0x1548   :  { %2349 = vmatpush3.msra.mxu0 %v2686_v7 }
0x1549   :  { %2364 = vmatprep.subr.mxu0 %v2570_v1 }
0x1601   :  { %v1249_v52 = vpop.f32.mrf.mxu0 }
0x1602   :  { %v1250_v53 = vadd.f32 %v2767_v19, %v1249_v52 }
0x1603   :  { %v2330_v54 = vpop.f32.mrf.mxu0 }
0x1604   :  { %1261 = vrot.lane.b32.xlu0 %v1250_v53, %s2572_s17  ;;  %v1253_v55 = vadd.f32 %v1250_v53, %v1077_v33  ;;  %v3129_v54 = vld [vmem:[%s3204_s5] ss:$0 sm:$0xff] }
0x1606   :  { %v2105_v56 = vmul.f32 -1.442695, %v1253_v55 }
0x1608   :  { %2464 = vpow2.f32 %v2105_v56 }
0x1615   :  { %v2465_v57 = vpop.eup %2464 }
0x1616   :  { %v1257_v58 = vadd.f32 1.0, %v2465_v57  ;;  %v1485_v57 = vld [vmem:[#allocation3 + $0x30] sm:$0xff] }
0x1618   :  { %2466 = vrcp.f32 %v1257_v58 }
0x1625   :  { %v2467_v59 = vpop.eup %2466 }
0x1626   :  { %v1271_v63 = vsub.f32 1.0, %v2467_v59  ;;  %v1277_v4 = vmul.f32 %v2467_v59, %v1177_v47 }
0x1676   :  { %v1262_v5 = vpop.permute.xlu0 %1261 }
0x1677   :  { %v1264_v60 = vmul.f32 %v2467_v59, %v1262_v5 }
0x1679   :  { %1266 = vrot.lane.b32.xlu1 %v1264_v60, %s2572_s17 }
0x16eb   :  { %v1267_v7 = vpop.permute.xlu1 %1266 }
0x16ec   :  { %v1269_v61 = vadd.f32 %v1267_v7, %v1077_v33 }
0x16ee   :  { %2468 = vtanh.f32 %v1269_v61 }
0x16fb   :  { %v2469_v62 = vpop.eup %2468 }
0x16fc   :  { %1273 = vrot.lane.b32.xlu0 %v2469_v62, %s2573_s3 }
0x176e   :  { %v1274_v3 = vpop.permute.xlu0 %1273 }
0x176f   :  { %v1276_v6 = vmul.f32 %v1274_v3, %v1271_v63 }
0x1771   :  { %v1278_v8 = vadd.f32 %v1277_v4, %v1276_v6 }
0x1773   :  { %1280 = vrot.lane.b32.xlu1 %v1278_v8, %s2573_s3 }
0x17e5   :  { %v1281_v9 = vpop.permute.xlu1 %1280 }
0x17e6   :  { %1283 = vst.msk [vmem:[#allocation7 + $0x4] sm:$0xf] %vm456_vm4, %v1281_v9  ;;  %2340 = vmatmul.mubr.msk.f32.vlgmr.msra.gmra.mxu1 %vm46_vm0, %v1281_v9 }
0x17e7   :  { %2354 = vmatpush3.msra.mxu1 %v3049_v24  ;;  %2361 = vmatprep.mubr.msk.f32.mxu1 %vm2571_vm1, %v2570_v1 }
0x17e8   :  { %2355 = vmatprep.subr.mxu1 %v2570_v1 }
0x17e9   :  { %2356 = vmatpush3.msra.mxu1 %v3058_v51 }
0x17ea   :  { %2357 = vmatprep.subr.mxu1 %v2570_v1 }
0x17eb   :  { %2358 = vmatpush3.msra.mxu1 %v3082_v48 }
0x17ec   :  { %2359 = vmatprep.subr.mxu1 %v2570_v1 }
0x17ed   :  { %2360 = vmatpush3.msra.mxu1 %v3089_v10 }
0x17ee   :  { %2375 = vmatprep.subr.mxu1 %v2570_v1 }
0x18a6   :  { %v1353_v11 = vpop.f32.mrf.mxu1 }
0x18a7   :  { %v1354_v12 = vadd.f32 %v2767_v19, %v1353_v11 }
0x18a8   :  { %v2341_v13 = vpop.f32.mrf.mxu1 }
0x18a9   :  { %1365 = vrot.lane.b32.xlu0 %v1354_v12, %s2572_s17  ;;  %v1357_v15 = vadd.f32 %v1354_v12, %v1284_v14 }
0x18ab   :  { %v2107_v16 = vmul.f32 -1.442695, %v1357_v15 }
0x18ad   :  { %2470 = vpow2.f32 %v2107_v16 }
0x18ba   :  { %v2471_v17 = vpop.eup %2470 }
0x18bb   :  { %v1361_v18 = vadd.f32 1.0, %v2471_v17 }
0x18bd   :  { %2472 = vrcp.f32 %v1361_v18 }
0x18ca   :  { %v2473_v20 = vpop.eup %2472 }
0x18cb   :  { %v1375_v27 = vsub.f32 1.0, %v2473_v20  ;;  %v1381_v30 = vmul.f32 %v2473_v20, %v1278_v8 }
0x191b   :  { %v1366_v21 = vpop.permute.xlu0 %1365 }
0x191c   :  { %v1368_v22 = vmul.f32 %v2473_v20, %v1366_v21 }
0x191e   :  { %1370 = vrot.lane.b32.xlu1 %v1368_v22, %s2572_s17 }
0x1990   :  { %v1371_v23 = vpop.permute.xlu1 %1370 }
0x1991   :  { %v1373_v25 = vadd.f32 %v1371_v23, %v1284_v14 }
0x1993   :  { %2474 = vtanh.f32 %v1373_v25 }
0x19a0   :  { %v2475_v26 = vpop.eup %2474 }
0x19a1   :  { %1377 = vrot.lane.b32.xlu0 %v2475_v26, %s2573_s3 }
0x1a13   :  { %v1378_v28 = vpop.permute.xlu0 %1377 }
0x1a14   :  { %v1380_v31 = vmul.f32 %v1378_v28, %v1375_v27 }
0x1a16   :  { %v1382_v0 = vadd.f32 %v1381_v30, %v1380_v31 }
0x1a18   :  { %1384 = vrot.lane.b32.xlu1 %v1382_v0, %s2573_s3 }
0x1a8a   :  { %v1385_v32 = vpop.permute.xlu1 %1384 }
0x1a8b   :  { %2351 = vmatmul.mubr.msk.f32.vlgmr.msra.gmra.mxu0 %vm46_vm0, %v1385_v32 }
0x1a8c   :  { %2365 = vmatpush3.msra.mxu0 %v3049_v24  ;;  %2372 = vmatprep.mubr.msk.f32.mxu0 %vm2571_vm1, %v2570_v1 }
0x1a8d   :  { %2366 = vmatprep.subr.mxu0 %v2570_v1 }
0x1a8e   :  { %2367 = vmatpush3.msra.mxu0 %v3058_v51 }
0x1a8f   :  { %2368 = vmatprep.subr.mxu0 %v2570_v1 }
0x1a90   :  { %2369 = vmatpush3.msra.mxu0 %v3082_v48 }
0x1a91   :  { %2370 = vmatprep.subr.mxu0 %v2570_v1 }
0x1a92   :  { %2371 = vmatpush3.msra.mxu0 %v3089_v10 }
0x1a93   :  { %2386 = vmatprep.subr.mxu0 %v2570_v1 }
0x1b4b   :  { %v1454_v33 = vpop.f32.mrf.mxu0 }
0x1b4c   :  { %v1455_v34 = vadd.f32 %v2767_v19, %v1454_v33 }
0x1b4d   :  { %v2352_v35 = vpop.f32.mrf.mxu0 }
0x1b4e   :  { %1466 = vrot.lane.b32.xlu0 %v1455_v34, %s2572_s17  ;;  %v1458_v2 = vadd.f32 %v1455_v34, %v1284_v14  ;;  %v1693_v34 = vld [vmem:[#allocation3 + $0x38] sm:$0xff] }
0x1b50   :  { %v2109_v36 = vmul.f32 -1.442695, %v1458_v2 }
0x1b52   :  { %2476 = vpow2.f32 %v2109_v36 }
0x1b5f   :  { %v2477_v37 = vpop.eup %2476 }
0x1b60   :  { %v1462_v38 = vadd.f32 1.0, %v2477_v37 }
0x1b62   :  { %2478 = vrcp.f32 %v1462_v38 }
0x1b6f   :  { %v2479_v39 = vpop.eup %2478 }
0x1b70   :  { %v1476_v19 = vsub.f32 1.0, %v2479_v39  ;;  %v1482_v46 = vmul.f32 %v2479_v39, %v1382_v0 }
0x1bc0   :  { %v1467_v40 = vpop.permute.xlu0 %1466 }
0x1bc1   :  { %v1469_v41 = vmul.f32 %v2479_v39, %v1467_v40 }
0x1bc3   :  { %1471 = vrot.lane.b32.xlu1 %v1469_v41, %s2572_s17 }
0x1c35   :  { %v1472_v42 = vpop.permute.xlu1 %1471 }
0x1c36   :  { %v1474_v44 = vadd.f32 %v1472_v42, %v1284_v14 }
0x1c38   :  { %2480 = vtanh.f32 %v1474_v44 }
0x1c45   :  { %v2481_v43 = vpop.eup %2480 }
0x1c46   :  { %1478 = vrot.lane.b32.xlu0 %v2481_v43, %s2573_s3 }
0x1cb8   :  { %v1479_v45 = vpop.permute.xlu0 %1478 }
0x1cb9   :  { %v1481_v47 = vmul.f32 %v1479_v45, %v1476_v19 }
0x1cbb   :  { %v1483_v50 = vadd.f32 %v1482_v46, %v1481_v47 }
0x1cbd   :  { %1487 = vrot.lane.b32.xlu1 %v1483_v50, %s2573_s3  ;;  %1484 = vst.msk [vmem:[#allocation7 + $0x4] sm:$0xf] %vm658_vm5, %v1483_v50 }
0x1d2f   :  { %v1488_v52 = vpop.permute.xlu1 %1487 }
0x1d30   :  { %2362 = vmatmul.mubr.msk.f32.vlgmr.msra.gmra.mxu1 %vm46_vm0, %v1488_v52 }
0x1d31   :  { %2376 = vmatpush3.msra.mxu1 %v3049_v24  ;;  %2383 = vmatprep.mubr.msk.f32.mxu1 %vm2571_vm1, %v2570_v1 }
0x1d32   :  { %2377 = vmatprep.subr.mxu1 %v2570_v1 }
0x1d33   :  { %2378 = vmatpush3.msra.mxu1 %v3058_v51 }
0x1d34   :  { %2379 = vmatprep.subr.mxu1 %v2570_v1 }
0x1d35   :  { %2380 = vmatpush3.msra.mxu1 %v3082_v48 }
0x1d36   :  { %2381 = vmatprep.subr.mxu1 %v2570_v1 }
0x1d37   :  { %2382 = vmatpush3.msra.mxu1 %v3089_v10 }
0x1d38   :  { %2397 = vmatprep.subr.mxu1 %v2570_v1 }
0x1df0   :  { %v1557_v53 = vpop.f32.mrf.mxu1 }
0x1df1   :  { %v1558_v55 = vadd.f32 %v3129_v54, %v1557_v53 }
0x1df2   :  { %v2363_v56 = vpop.f32.mrf.mxu1 }
0x1df3   :  { %1569 = vrot.lane.b32.xlu0 %v1558_v55, %s2572_s17  ;;  %v1561_v58 = vadd.f32 %v1558_v55, %v1485_v57 }
0x1df5   :  { %v2111_v59 = vmul.f32 -1.442695, %v1561_v58 }
0x1df7   :  { %2482 = vpow2.f32 %v2111_v59 }
0x1e04   :  { %v2483_v5 = vpop.eup %2482 }
0x1e05   :  { %v1565_v60 = vadd.f32 1.0, %v2483_v5 }
0x1e07   :  { %2484 = vrcp.f32 %v1565_v60 }
0x1e14   :  { %v2485_v7 = vpop.eup %2484 }
0x1e15   :  { %v1579_v6 = vsub.f32 1.0, %v2485_v7  ;;  %v1585_v9 = vmul.f32 %v2485_v7, %v1483_v50 }
0x1e65   :  { %v1570_v61 = vpop.permute.xlu0 %1569 }
0x1e66   :  { %v1572_v62 = vmul.f32 %v2485_v7, %v1570_v61 }
0x1e68   :  { %1574 = vrot.lane.b32.xlu1 %v1572_v62, %s2572_s17 }
0x1eda   :  { %v1575_v63 = vpop.permute.xlu1 %1574 }
0x1edb   :  { %v1577_v3 = vadd.f32 %v1575_v63, %v1485_v57 }
0x1edd   :  { %2486 = vtanh.f32 %v1577_v3  ;;  %v1902_v3 = vld [vmem:[%s3205_s6 + $0x10] sm:$0xff] }
0x1eea   :  { %v2487_v4 = vpop.eup %2486 }
0x1eeb   :  { %1581 = vrot.lane.b32.xlu0 %v2487_v4, %s2573_s3  ;;  %v1901_v4 = vld [vmem:[%s3205_s6 + $0x8] sm:$0xff] }
0x1f5d   :  { %v1582_v8 = vpop.permute.xlu0 %1581 }
0x1f5e   :  { %v1584_v11 = vmul.f32 %v1582_v8, %v1579_v6  ;;  %v1900_v6 = vld [vmem:[%s3205_s6] sm:$0xff] }
0x1f60   :  { %v1586_v12 = vadd.f32 %v1585_v9, %v1584_v11 }
0x1f62   :  { %1588 = vrot.lane.b32.xlu1 %v1586_v12, %s2573_s3 }
0x1fd4   :  { %v1589_v13 = vpop.permute.xlu1 %1588 }
0x1fd5   :  { %2373 = vmatmul.mubr.msk.f32.vlgmr.msra.gmra.mxu0 %vm46_vm0, %v1589_v13 }
0x1fd6   :  { %2387 = vmatpush3.msra.mxu0 %v3049_v24  ;;  %2394 = vmatprep.mubr.msk.f32.mxu0 %vm2571_vm1, %v2570_v1 }
0x1fd7   :  { %2388 = vmatprep.subr.mxu0 %v2570_v1 }
0x1fd8   :  { %2389 = vmatpush3.msra.mxu0 %v3058_v51 }
0x1fd9   :  { %2390 = vmatprep.subr.mxu0 %v2570_v1 }
0x1fda   :  { %2391 = vmatpush3.msra.mxu0 %v3082_v48 }
0x1fdb   :  { %2392 = vmatprep.subr.mxu0 %v2570_v1 }
0x1fdc   :  { %2393 = vmatpush3.msra.mxu0 %v3089_v10 }
0x2095   :  { %v1658_v14 = vpop.f32.mrf.mxu0 }
0x2096   :  { %v1659_v15 = vadd.f32 %v3129_v54, %v1658_v14 }
0x2097   :  { %v2374_v16 = vpop.f32.mrf.mxu0 }
0x2098   :  { %1670 = vrot.lane.b32.xlu0 %v1659_v15, %s2572_s17  ;;  %v1662_v24 = vadd.f32 %v1659_v15, %v1485_v57 }
0x209a   :  { %v2113_v17 = vmul.f32 -1.442695, %v1662_v24 }
0x209c   :  { %2488 = vpow2.f32 %v2113_v17 }
0x20a9   :  { %v2489_v18 = vpop.eup %2488 }
0x20aa   :  { %v1666_v20 = vadd.f32 1.0, %v2489_v18 }
0x20ac   :  { %2490 = vrcp.f32 %v1666_v20 }
0x20b9   :  { %v2491_v51 = vpop.eup %2490 }
0x20ba   :  { %v1680_v25 = vsub.f32 1.0, %v2491_v51  ;;  %v1686_v27 = vmul.f32 %v2491_v51, %v1586_v12 }
0x210a   :  { %v1671_v21 = vpop.permute.xlu0 %1670 }
0x210b   :  { %v1673_v22 = vmul.f32 %v2491_v51, %v1671_v21 }
0x210d   :  { %1675 = vrot.lane.b32.xlu1 %v1673_v22, %s2572_s17 }
0x217f   :  { %v1676_v48 = vpop.permute.xlu1 %1675 }
0x2180   :  { %v1678_v23 = vadd.f32 %v1676_v48, %v1485_v57 }
0x2182   :  { %2492 = vtanh.f32 %v1678_v23 }
0x218f   :  { %v2493_v10 = vpop.eup %2492 }
0x2190   :  { %1682 = vrot.lane.b32.xlu0 %v2493_v10, %s2573_s3 }
0x2202   :  { %v1683_v26 = vpop.permute.xlu0 %1682 }
0x2203   :  { %v1685_v28 = vmul.f32 %v1683_v26, %v1680_v25 }
0x2205   :  { %v3150_v30 = vadd.f32 %v1686_v27, %v1685_v28 }
0x2207   :  { %1694 = vrot.lane.b32.xlu1 %v3150_v30, %s2573_s3 }
0x2279   :  { %v1695_v31 = vpop.permute.xlu1 %1694 }
0x227a   :  { %2384 = vmatmul.mubr.msk.f32.vlgmr.msra.gmra.mxu1 %vm46_vm0, %v1695_v31 }
0x227b   :  { %2405 = vmatprep.mubr.msk.f32.mxu1 %vm2571_vm1, %v2570_v1 }
0x233a   :  { %v1764_v0 = vpop.f32.mrf.mxu1 }
0x233b   :  { %v1765_v32 = vadd.f32 %v3129_v54, %v1764_v0 }
0x233c   :  { %v2385_v33 = vpop.f32.mrf.mxu1 }
0x233d   :  { %1776 = vrot.lane.b32.xlu0 %v1765_v32, %s2572_s17  ;;  %v1768_v35 = vadd.f32 %v1765_v32, %v1693_v34 }
0x233f   :  { %v2115_v2 = vmul.f32 -1.442695, %v1768_v35 }
0x2341   :  { %2494 = vpow2.f32 %v2115_v2 }
0x234e   :  { %v2495_v36 = vpop.eup %2494 }
0x234f   :  { %v1772_v37 = vadd.f32 1.0, %v2495_v36 }
0x2351   :  { %2496 = vrcp.f32 %v1772_v37 }
0x235e   :  { %v2497_v38 = vpop.eup %2496 }
0x235f   :  { %v1786_v43 = vsub.f32 1.0, %v2497_v38  ;;  %v1792_v45 = vmul.f32 %v2497_v38, %v3150_v30 }
0x23af   :  { %v1777_v39 = vpop.permute.xlu0 %1776 }
0x23b0   :  { %v1779_v40 = vmul.f32 %v2497_v38, %v1777_v39 }
0x23b2   :  { %1781 = vrot.lane.b32.xlu1 %v1779_v40, %s2572_s17 }
0x2424   :  { %v1782_v41 = vpop.permute.xlu1 %1781 }
0x2425   :  { %v1784_v42 = vadd.f32 %v1782_v41, %v1693_v34 }
0x2427   :  { %2498 = vtanh.f32 %v1784_v42 }
0x2434   :  { %v2499_v44 = vpop.eup %2498 }
0x2435   :  { %1788 = vrot.lane.b32.xlu0 %v2499_v44, %s2573_s3 }
0x24a7   :  { %v1789_v19 = vpop.permute.xlu0 %1788 }
0x24a8   :  { %v1791_v46 = vmul.f32 %v1789_v19, %v1786_v43 }
0x24aa   :  { %v1793_v47 = vadd.f32 %v1792_v45, %v1791_v46 }
0x24ac   :  { %1795 = vrot.lane.b32.xlu1 %v1793_v47, %s2573_s3 }
0x251e   :  { %v1796_v50 = vpop.permute.xlu1 %1795 }
0x251f   :  { %2395 = vmatmul.mubr.msk.f32.vlgmr.msra.gmra.mxu0 %vm46_vm0, %v1796_v50 }
0x25df   :  { %v1865_v52 = vpop.f32.mrf.mxu0 }
0x25e0   :  { %v1866_v53 = vadd.f32 %v3129_v54, %v1865_v52  ;;  %v1903_v54 = vld [vmem:[%s3205_s6 + $0x18] sm:$0xff]  ;;  %s2575_s6 = smov [#allocation7]  }
0x25e1   :  { %v2396_v55 = vpop.f32.mrf.mxu0  ;;  %2398 = vmatpush3.msra.mxu1 %v1903_v54  ;;  %s1993_s28 = sshll.u32 %s2575_s6, 4  ;;  %s1994_s28 = int_to_ptr.vmem [resolvable:$true] %s1993_s28 }
0x25e2   :  { %1877 = vrot.lane.b32.xlu0 %v1866_v53, %s2572_s17  ;;  %v1869_v56 = vadd.f32 %v1866_v53, %v1693_v34  ;;  %2399 = vmatprep.subr.mxu1 %v2570_v1  ;;  %s2523_s25 = scalar_lea.vmem %s1994_s28, 128  ;;  %p2528_p6 = scmp.lt.s32.totalorder %s1994_s28, %s1994_s28 }
0x25e3   :  { %2400 = vmatpush3.msra.mxu1 %v1902_v3  ;;  %p2524_p5 = scmp.ne.s32.totalorder %s1994_s28, %s2523_s25  ;;  %p2529_p7 = scmp.lt.s32.totalorder %s2523_s25, %s2523_s25 }
0x25e4   :  { %v2117_v57 = vmul.f32 -1.442695, %v1869_v56  ;;  %2401 = vmatprep.subr.mxu1 %v2570_v1 }
0x25e5   :  { %2402 = vmatpush3.msra.mxu1 %v1901_v4  ;;  %p2530_p8 = por %p2529_p7, %p2528_p6 }
0x25e6   :  { %2500 = vpow2.f32 %v2117_v57  ;;  %2403 = vmatprep.subr.mxu1 %v2570_v1 }
0x25e7   :  { %2404 = vmatpush3.msra.mxu1 %v1900_v6  ;;  %p2531_p9 = pnand %p2530_p8, %p2524_p5 }
0x25f3   :  { %v2501_v58 = vpop.eup %2500 }
0x25f4   :  { %v1873_v59 = vadd.f32 1.0, %v2501_v58 }
0x25f6   :  { %2502 = vrcp.f32 %v1873_v59 }
0x2603   :  { %v2503_v5 = vpop.eup %2502 }
0x2604   :  { %v1887_v8 = vsub.f32 1.0, %v2503_v5  ;;  %v1893_v11 = vmul.f32 %v2503_v5, %v1793_v47 }
0x2654   :  { %v1878_v60 = vpop.permute.xlu0 %1877 }
0x2655   :  { %v1880_v7 = vmul.f32 %v2503_v5, %v1878_v60 }
0x2657   :  { %1882 = vrot.lane.b32.xlu1 %v1880_v7, %s2572_s17 }
0x26c9   :  { %v1883_v61 = vpop.permute.xlu1 %1882 }
0x26ca   :  { %v1885_v62 = vadd.f32 %v1883_v61, %v1693_v34 }
0x26cc   :  { %2504 = vtanh.f32 %v1885_v62 }
0x26d9   :  { %v2505_v63 = vpop.eup %2504 }
0x26da   :  { %1889 = vrot.lane.b32.xlu0 %v2505_v63, %s2573_s3 }
0x26de   :  { %864 = vrot.lane.b32.xlu0 %v2988_v49, %s2574_s16 }
0x26e2   :  { %1072 = vrot.lane.b32.xlu0 %v3024_v29, %s2572_s17 }
0x274c   :  { %v1890_v9 = vpop.permute.xlu0 %1889 }
0x274d   :  { %v1892_v12 = vmul.f32 %v1890_v9, %v1887_v8 }
0x274f   :  { %v1894_v13 = vadd.f32 %v1893_v11, %v1892_v12 }
0x2750   :  { %v865_v14 = vpop.permute.xlu0 %864 }
0x2751   :  { %868 = vst.msk [vmem:[#allocation7] sm:$0xf] %vm867_vm6, %v865_v14  ;;  %1911 = vrot.lane.b32.xlu1 %v1894_v13, %s2573_s3 }
0x2754   :  { %v1073_v15 = vpop.permute.xlu0 %1072 }
0x2755   :  { %1689 = vrot.lane.b32.xlu1 %v3150_v30, %s2574_s16  ;;  %1076 = vst.msk [vmem:[#allocation7] sm:$0xf] %vm1075_vm7, %v1073_v15 }
0x2759   :  { %1896 = vrot.lane.b32.xlu1 %v1894_v13, %s2572_s17 }
0x27c3   :  { %v1912_v1 = vpop.permute.xlu1 %1911 }
0x27c4   :  { %2406 = vmatmul.mubr.msk.f32.vlgmr.msra.gmra.mxu1 %vm46_vm0, %v1912_v1 }
0x27c7   :  { %v1690_v49 = vpop.permute.xlu1 %1689 }
0x27c8   :  { %1692 = vst.msk [vmem:[#allocation7 + $0x4] sm:$0xf] %vm867_vm6, %v1690_v49 }
0x27cb   :  { %v1897_v29 = vpop.permute.xlu1 %1896 }
0x27cc   :  { %1899 = vst.msk [vmem:[#allocation7 + $0x4] sm:$0xf] %vm1075_vm7, %v1897_v29 }
0x27cd   :  { %2534 = shalt.err (!%p2531_p9)
}
0x27ce   :  { %1996 = dma.vmem_to_hbm [thread:$0]  %s1994_s28, 128, %s3207_s8, [#allocation5]   ;;  %v2118_v16 = vld [vmem:[%s3206_s7] ss:$0 sm:$0xff]  ;;  %vm1985_vm8 = vcmask 76800  }
0x27cf   :  { %s2576_s21 = smov [#allocation8]  }
0x27d0   :  { %s2003_s29 = sshll.u32 %s2576_s21, 4  ;;  %s2004_s29 = int_to_ptr.vmem [resolvable:$true] %s2003_s29 }
0x27d1   :  { %s2543_s1 = scalar_lea.vmem %s2004_s29, 64  ;;  %p2548_p11 = scmp.lt.s32.totalorder %s2004_s29, %s2004_s29 }
0x27d2   :  { %p2544_p10 = scmp.ne.s32.totalorder %s2004_s29, %s2543_s1  ;;  %p2549_p12 = scmp.lt.s32.totalorder %s2543_s1, %s2543_s1 }
0x27d4   :  { %p2550_p13 = por %p2549_p12, %p2548_p11 }
0x27d6   :  { %p2551_p0 = pnand %p2550_p13, %p2544_p10 }
0x2884   :  { %v1981_v24 = vpop.f32.mrf.mxu1 }
0x2885   :  { %v1982_v17 = vadd.f32 %v2118_v16, %v1981_v24 }
0x2886   :  { %v2407_v18 = vpop.f32.mrf.mxu1 }
0x2887   :  { %1986 = vst.msk [vmem:[#allocation8] sm:$0xf] %vm1985_vm8, %v1982_v17 }
0x2888   :  { %2554 = shalt.err (!%p2551_p0)
}
0x2889   :  { %2006 = dma.vmem_to_hbm [thread:$0]  %s2004_s29, 64, %s3208_s9, [#allocation9]  }
0x288a   :  { %2565 = dma.done.wait [#allocation5], 128  }
0x288b   :  { %2566 = vsyncadd [#allocation5], 4294967168 }
0x288c   :  { %2567 = dma.done.wait [#allocation9], 64  }
0x288d   :  { %2568 = vsyncadd [#allocation9], 4294967232 }
0x288e   :  { %2013 = vsyncpa [#allocation5], 1 }
0x288f   :  { %2014 = vsyncpa [#allocation9], 1 }
0x2890   :  { %2015 = vsyncpa [#allocation6], 1 }

</bundles_post_ra>
